<compile_context>
chip_gen: v6e
topology: v6e:2x2x1
jax: 0.10.0
libtpu: 0.0.40
codegen_flags: <defaults>
</compile_context>

<pallas_src>
import jax
import jax.numpy as jnp
import numpy as np
from jax.experimental import pallas as pl
from jax.experimental.pallas import tpu as pltpu


# ---------------------------------------------------------------------------
# Diffusion schedule buffers (make_beta_schedule('linear') exactly as in torch)
# ---------------------------------------------------------------------------
def make_diffusion_buffers(timesteps, linear_start=1e-4, linear_end=2e-2):
    betas = np.linspace(linear_start ** 0.5, linear_end ** 0.5, timesteps,
                        dtype=np.float64) ** 2
    alphas = 1.0 - betas
    alphas_cumprod = np.cumprod(alphas, axis=0)
    return {
        "sqrt_alphas_cumprod":
            jnp.asarray(np.sqrt(alphas_cumprod), jnp.float32),
        "sqrt_one_minus_alphas_cumprod":
            jnp.asarray(np.sqrt(1.0 - alphas_cumprod), jnp.float32),
    }


# ---------------------------------------------------------------------------
# Pallas kernel: q_sample + fused synthetic denoiser + masked-L1 partial
# grid = (batch_blocks [parallel], time_tiles [arbitrary / reduction])
# ---------------------------------------------------------------------------
def diffusion_loss_kernel(ca_ref, cb_ref, te_ref,      # (Bb,1,1) f32 schedule / time-emb
                          x_ref, n_ref, c_ref, o_ref,  # (Bb,Tt,{M,M,H,H2}) bf16 activations
                          m_ref,                       # (Bb,Tt,1) bf16 nonpadding mask
                          w_ref,                       # (M+H+H2, M) bf16 fused weights
                          part_ref):                   # (1,1,M) f32 resident partial-loss
    Bb, Tt, M = x_ref.shape
    H = c_ref.shape[-1]
    H2 = o_ref.shape[-1]
    N = Bb * Tt

    # ---- init resident accumulator at first time tile ----------------------
    @pl.when(pl.program_id(1) == 0)
    def _():
        part_ref[...] = jnp.zeros_like(part_ref)

    # ---- q_sample (f32 elementwise; bf16 only on the HBM side) -------------
    x = x_ref[...].astype(jnp.float32)
    n = n_ref[...].astype(jnp.float32)
    x_noisy = ca_ref[...] * x + cb_ref[...] * n                      # (Bb,Tt,M)

    # ---- fused synthetic denoise_fn: one (N,K)@(K,M) MXU pass --------------
    feats = jnp.concatenate(
        [x_noisy.reshape(N, M),
         c_ref[...].astype(jnp.float32).reshape(N, H),
         o_ref[...].astype(jnp.float32).reshape(N, H2)],
        axis=-1)                                                     # (N, K) f32
    pred = jnp.dot(feats.astype(jnp.bfloat16), w_ref[...],
                   preferred_element_type=jnp.float32)               # (N, M) f32
    pred = pred.reshape(Bb, Tt, M) + te_ref[...]                     # (Bb,Tt,M)

    # ---- masked L1, lane-preserving partial reduction ----------------------
    diff = jnp.abs(n - pred) * m_ref[...].astype(jnp.float32)        # (Bb,Tt,M)
    d2 = jnp.sum(diff, axis=0)                   # (Tt,M): leading-axis adds (VPU)
    part_ref[...] += jnp.sum(d2, axis=0, keepdims=True)[None]        # (1,1,M)


def _pick_time_block(T, max_tile=1024):
    """Largest tile <= max_tile that divides T and keeps the (8,128) sublane rule."""
    if T <= max_tile:
        return T
    for tt in range(max_tile, 7, -1):
        if T % tt == 0 and tt % 8 == 0:
            return tt
    return T


# ---------------------------------------------------------------------------
# Wrapper = GaussianDiffusion.forward(infer=False)
# ---------------------------------------------------------------------------
def gaussian_diffusion_forward(inps, tgt, nonpadding, optional_cond,
                               t, noise, params, buffers,
                               *, batch_block=None, time_block=None):
    """Training forward (infer=False).

    inps: (B,T,H), tgt: (B,T,M), nonpadding: (B,T), optional_cond: (B,T,H2),
    t: (B,) int32, noise: (B,T,M).  Returns (diff_loss, None) like the module.
    """
    B, T, H = inps.shape
    M = tgt.shape[-1]
    H2 = optional_cond.shape[-1]
    K = M + H + H2

    Bb = B if batch_block is None else batch_block
    assert B % Bb == 0, "batch_block must divide B"
    nblocks = B // Bb

    Tt = _pick_time_block(T) if time_block is None else time_block
    assert T % Tt == 0, "time_block must divide T"
    assert Tt == T or Tt % 8 == 0, "time_block must be a multiple of 8 (sublane rule)"
    ntiles = T // Tt

    act = jnp.bfloat16
    # Native [B,T,*] layouts go straight to the kernel (no HBM transposes).
    # The casts are no-ops when the caller already supplies bf16 activations.
    x = tgt.astype(act)
    n = noise.astype(act)
    c = inps.astype(act)
    o = optional_cond.astype(act)
    m = nonpadding[:, :, None].astype(act)

    # Fuse the three denoiser weights into a single (K, M) operand (tiny, once).
    w = jnp.concatenate([params["w_x"].T, params["w_cond"].T, params["w_opt"].T],
                        axis=0).astype(act)

    # Schedule gathers ("extract") and the time embedding — B scalars each.
    ca = buffers["sqrt_alphas_cumprod"][t][:, None, None]             # (B,1,1)
    cb = buffers["sqrt_one_minus_alphas_cumprod"][t][:, None, None]   # (B,1,1)
    te = params["time_emb"][t][:, None, None]                         # (B,1,1)

    partials = pl.pallas_call(
        diffusion_loss_kernel,
        out_shape=jax.ShapeDtypeStruct((nblocks, 1, M), jnp.float32),
        grid_spec=pltpu.PrefetchScalarGridSpec(
            num_scalar_prefetch=0,
            grid=(nblocks, ntiles),
            in_specs=[
                pl.BlockSpec((Bb, 1, 1), lambda i, j: (i, 0, 0)),    # sqrt(acum[t])
                pl.BlockSpec((Bb, 1, 1), lambda i, j: (i, 0, 0)),    # sqrt(1-acum[t])
                pl.BlockSpec((Bb, 1, 1), lambda i, j: (i, 0, 0)),    # time_emb[t]
                pl.BlockSpec((Bb, Tt, M), lambda i, j: (i, j, 0)),   # x0 (tgt)
                pl.BlockSpec((Bb, Tt, M), lambda i, j: (i, j, 0)),   # noise
                pl.BlockSpec((Bb, Tt, H), lambda i, j: (i, j, 0)),   # cond (inps)
                pl.BlockSpec((Bb, Tt, H2), lambda i, j: (i, j, 0)),  # optional_cond
                pl.BlockSpec((Bb, Tt, 1), lambda i, j: (i, j, 0)),   # nonpadding
                pl.BlockSpec((K, M), lambda i, j: (0, 0)),           # fused weights
            ],
            # Output block index independent of j -> resident f32 accumulator
            # across the (last, "arbitrary") time-tile reduction axis.
            out_specs=pl.BlockSpec((1, 1, M), lambda i, j: (i, 0, 0)),
        ),
        compiler_params=pltpu.CompilerParams(
            dimension_semantics=("parallel", "arbitrary")),
    )(ca, cb, te, x, n, c, o, m, w)

    # Final tiny reduction + torch .mean() normalisation over B*1*M*T elements.
    loss = jnp.sum(partials) * (1.0 / float(B * M * T))
    return loss, None


# ---------------------------------------------------------------------------
# Pure-JAX reference of the same math (mirrors the kernel's bf16 boundaries)
# ---------------------------------------------------------------------------
def _reference(inps, tgt, nonpadding, optional_cond, t, noise, params, buffers):
    f32 = jnp.float32
    x0 = tgt.astype(f32)
    n = noise.astype(f32)
    c = inps.astype(f32)
    o = optional_cond.astype(f32)
    ca = buffers["sqrt_alphas_cumprod"][t][:, None, None]
    cb = buffers["sqrt_one_minus_alphas_cumprod"][t][:, None, None]
    te = params["time_emb"][t][:, None, None]
    x_noisy = ca * x0 + cb * n
    w = jnp.concatenate([params["w_x"].T, params["w_cond"].T, params["w_opt"].T],
                        axis=0).astype(jnp.bfloat16)
    feats = jnp.concatenate([x_noisy, c, o], axis=-1).astype(jnp.bfloat16)
    pred = jnp.einsum("btk,km->btm", feats, w,
                      preferred_element_type=f32) + te
    return jnp.mean(jnp.abs(n - pred) * nonpadding.astype(f32)[:, :, None])


if __name__ == "__main__":
    B, T, H, H2, M = 2, 128, 32, 32, 32      # M = out_dims (mel bins)
    TIMESTEPS = 100

    key = jax.random.PRNGKey(0)
    k = jax.random.split(key, 10)

    act = jnp.bfloat16
    # Activations are produced in bf16 (as an upstream bf16 network would).
    inps = jax.random.normal(k[0], (B, T, H), jnp.float32).astype(act)           # cond
    optional_cond = jax.random.normal(k[1], (B, T, H2), jnp.float32).astype(act)
    tgt = jax.random.normal(k[2], (B, T, M), jnp.float32).astype(act)            # target mel
    nonpadding = (jax.random.uniform(k[3], (B, T)) > 0.2).astype(jnp.float32)
    noise = jax.random.normal(k[4], (B, T, M), jnp.float32).astype(act)          # q_sample noise
    t = jax.random.randint(k[5], (B,), 0, TIMESTEPS, jnp.int32)                  # timesteps

    params = {
        "w_x":    0.05 * jax.random.normal(k[6], (M, M), jnp.float32),
        "w_cond": 0.05 * jax.random.normal(k[7], (M, H), jnp.float32),
        "w_opt":  0.05 * jax.random.normal(k[8], (M, H2), jnp.float32),
        "time_emb": 0.1 * jax.random.normal(k[9], (TIMESTEPS,), jnp.float32),
    }
    buffers = make_diffusion_buffers(TIMESTEPS)

    ref = jax.block_until_ready(
        _reference(inps, tgt, nonpadding, optional_cond, t, noise, params, buffers))

    # Default path: single time tile (whole T in one grid step).
    loss0, _ = gaussian_diffusion_forward(inps, tgt, nonpadding, optional_cond,
                                          t, noise, params, buffers)
    loss0 = jax.block_until_ready(loss0)
    np.testing.assert_allclose(np.asarray(loss0), np.asarray(ref),
                               rtol=1e-4, atol=1e-5)

    # Tiled-T path: exercises the "arbitrary" reduction axis / resident accumulator.
    loss1, _ = gaussian_diffusion_forward(inps, tgt, nonpadding, optional_cond,
                                          t, noise, params, buffers, time_block=64)
    loss1 = jax.block_until_ready(loss1)
    np.testing.assert_allclose(np.asarray(loss1), np.asarray(ref),
                               rtol=1e-4, atol=1e-5)

    print("KERNEL_OK")
</pallas_src>

<mosaic_0001>
module attributes {stable_mosaic.version = 11 : i64} {
  func.func @diffusion_loss_kernel(%arg0: i32, %arg1: i32, %arg2: memref<2x1x1xf32, #tpu.memory_space<vmem>>, %arg3: memref<2x1x1xf32, #tpu.memory_space<vmem>>, %arg4: memref<2x1x1xf32, #tpu.memory_space<vmem>>, %arg5: memref<2x128x32xbf16, #tpu.memory_space<vmem>>, %arg6: memref<2x128x32xbf16, #tpu.memory_space<vmem>>, %arg7: memref<2x128x32xbf16, #tpu.memory_space<vmem>>, %arg8: memref<2x128x32xbf16, #tpu.memory_space<vmem>>, %arg9: memref<2x128x1xbf16, #tpu.memory_space<vmem>>, %arg10: memref<96x32xbf16, #tpu.memory_space<vmem>>, %arg11: memref<1x1x32xf32, #tpu.memory_space<vmem>>) attributes {dimension_semantics = [#tpu.dimension_semantics<parallel>, #tpu.dimension_semantics<arbitrary>], iteration_bounds = array<i64: 1, 1>, scalar_prefetch = 0 : i64, scratch_operands = 0 : i64, tpu.core_type = #tpu.core_type<tc>, window_params = [{transform_indices = @transform_0, window_bounds = array<i64: 2, 1, 1>}, {transform_indices = @transform_1, window_bounds = array<i64: 2, 1, 1>}, {transform_indices = @transform_2, window_bounds = array<i64: 2, 1, 1>}, {transform_indices = @transform_3, window_bounds = array<i64: 2, 128, 32>}, {transform_indices = @transform_4, window_bounds = array<i64: 2, 128, 32>}, {transform_indices = @transform_5, window_bounds = array<i64: 2, 128, 32>}, {transform_indices = @transform_6, window_bounds = array<i64: 2, 128, 32>}, {transform_indices = @transform_7, window_bounds = array<i64: 2, 128, 1>}, {pipeline_mode = #tpu.pipeline_mode<synchronous>, transform_indices = @transform_8, window_bounds = array<i64: 96, 32>}, {transform_indices = @transform_9, window_bounds = array<i64: 1, 1, 32>}]} {
    %c0_i32 = arith.constant 0 : i32
    %0 = arith.cmpi eq, %arg1, %c0_i32 : i32
    %1 = arith.extui %0 : i1 to i32
    %c0_i32_0 = arith.constant 0 : i32
    %2 = arith.cmpi ne, %1, %c0_i32_0 : i32
    scf.if %2 {
      %cst_34 = arith.constant 0.000000e+00 : f32
      %42 = vector.broadcast %cst_34 : f32 to vector<1x1x32xf32>
      %c0_35 = arith.constant 0 : index
      %c0_36 = arith.constant 0 : index
      %c0_37 = arith.constant 0 : index
      %43 = vector.load %arg11[%c0_35, %c0_36, %c0_37] : memref<1x1x32xf32, #tpu.memory_space<vmem>>, vector<1x1x32xf32>
      tpu.vector_store %arg11[%c0_35, %c0_36, %c0_37], %42 {strides = array<i32>} : memref<1x1x32xf32, #tpu.memory_space<vmem>>, vector<1x1x32xf32>,
    } else {
    }
    %c0 = arith.constant 0 : index
    %c0_1 = arith.constant 0 : index
    %c0_2 = arith.constant 0 : index
    %3 = vector.load %arg5[%c0, %c0_1, %c0_2] : memref<2x128x32xbf16, #tpu.memory_space<vmem>>, vector<2x128x32xbf16>
    %4 = arith.extf %3 : vector<2x128x32xbf16> to vector<2x128x32xf32>
    %c0_3 = arith.constant 0 : index
    %c0_4 = arith.constant 0 : index
    %c0_5 = arith.constant 0 : index
    %5 = vector.load %arg6[%c0_3, %c0_4, %c0_5] : memref<2x128x32xbf16, #tpu.memory_space<vmem>>, vector<2x128x32xbf16>
    %6 = arith.extf %5 : vector<2x128x32xbf16> to vector<2x128x32xf32>
    %c0_6 = arith.constant 0 : index
    %c0_7 = arith.constant 0 : index
    %c0_8 = arith.constant 0 : index
    %7 = vector.load %arg2[%c0_6, %c0_7, %c0_8] : memref<2x1x1xf32, #tpu.memory_space<vmem>>, vector<2x1x1xf32>
    %8 = vector.broadcast %7 : vector<2x1x1xf32> to vector<2x128x32xf32>
    %9 = arith.mulf %8, %4 : vector<2x128x32xf32>
    %c0_9 = arith.constant 0 : index
    %c0_10 = arith.constant 0 : index
    %c0_11 = arith.constant 0 : index
    %10 = vector.load %arg3[%c0_9, %c0_10, %c0_11] : memref<2x1x1xf32, #tpu.memory_space<vmem>>, vector<2x1x1xf32>
    %11 = vector.broadcast %10 : vector<2x1x1xf32> to vector<2x128x32xf32>
    %12 = arith.mulf %11, %6 : vector<2x128x32xf32>
    %13 = arith.addf %9, %12 : vector<2x128x32xf32>
    %14 = vector.shape_cast %13 : vector<2x128x32xf32> to vector<256x32xf32>
    %c0_12 = arith.constant 0 : index
    %c0_13 = arith.constant 0 : index
    %c0_14 = arith.constant 0 : index
    %15 = vector.load %arg7[%c0_12, %c0_13, %c0_14] : memref<2x128x32xbf16, #tpu.memory_space<vmem>>, vector<2x128x32xbf16>
    %16 = arith.extf %15 : vector<2x128x32xbf16> to vector<2x128x32xf32>
    %17 = vector.shape_cast %16 : vector<2x128x32xf32> to vector<256x32xf32>
    %c0_15 = arith.constant 0 : index
    %c0_16 = arith.constant 0 : index
    %c0_17 = arith.constant 0 : index
    %18 = vector.load %arg8[%c0_15, %c0_16, %c0_17] : memref<2x128x32xbf16, #tpu.memory_space<vmem>>, vector<2x128x32xbf16>
    %19 = arith.extf %18 : vector<2x128x32xbf16> to vector<2x128x32xf32>
    %20 = vector.shape_cast %19 : vector<2x128x32xf32> to vector<256x32xf32>
    %21 = tpu.concatenate %14, %17, %20 in 1 : vector<256x32xf32>, vector<256x32xf32>, vector<256x32xf32> -> vector<256x96xf32>
    %22 = arith.truncf %21 : vector<256x96xf32> to vector<256x96xbf16>
    %c0_18 = arith.constant 0 : index
    %c0_19 = arith.constant 0 : index
    %23 = vector.load %arg10[%c0_18, %c0_19] : memref<96x32xbf16, #tpu.memory_space<vmem>>, vector<96x32xbf16>
    %cst = arith.constant dense<0.000000e+00> : vector<256x32xf32>
    %24 = tpu.matmul %22, %23, %cst {dimension_numbers = #tpu.dot_dimension_numbers<[1], [0], [0], [1], [0, 0, 1, 1], [], []>} : vector<256x96xbf16>, vector<96x32xbf16>, vector<256x32xf32> -> vector<256x32xf32>
    %25 = vector.shape_cast %24 : vector<256x32xf32> to vector<2x128x32xf32>
    %c0_20 = arith.constant 0 : index
    %c0_21 = arith.constant 0 : index
    %c0_22 = arith.constant 0 : index
    %26 = vector.load %arg4[%c0_20, %c0_21, %c0_22] : memref<2x1x1xf32, #tpu.memory_space<vmem>>, vector<2x1x1xf32>
    %27 = vector.broadcast %26 : vector<2x1x1xf32> to vector<2x128x32xf32>
    %28 = arith.addf %25, %27 : vector<2x128x32xf32>
    %29 = arith.subf %6, %28 : vector<2x128x32xf32>
    %30 = math.absf %29 : vector<2x128x32xf32>
    %c0_23 = arith.constant 0 : index
    %c0_24 = arith.constant 0 : index
    %c0_25 = arith.constant 0 : index
    %31 = vector.load %arg9[%c0_23, %c0_24, %c0_25] : memref<2x128x1xbf16, #tpu.memory_space<vmem>>, vector<2x128x1xbf16>
    %32 = arith.extf %31 : vector<2x128x1xbf16> to vector<2x128x1xf32>
    %33 = vector.broadcast %32 : vector<2x128x1xf32> to vector<2x128x32xf32>
    %34 = arith.mulf %30, %33 : vector<2x128x32xf32>
    %cst_26 = arith.constant dense<0.000000e+00> : vector<128x32xf32>
    %35 = vector.multi_reduction <add>, %34, %cst_26 [0] : vector<2x128x32xf32> to vector<128x32xf32>
    %c0_27 = arith.constant 0 : index
    %c0_28 = arith.constant 0 : index
    %c0_29 = arith.constant 0 : index
    %36 = vector.load %arg11[%c0_27, %c0_28, %c0_29] : memref<1x1x32xf32, #tpu.memory_space<vmem>>, vector<1x1x32xf32>
    %cst_30 = arith.constant dense<0.000000e+00> : vector<32xf32>
    %37 = vector.multi_reduction <add>, %35, %cst_30 [0] : vector<128x32xf32> to vector<32xf32>
    %38 = vector.shape_cast %37 : vector<32xf32> to vector<1x32xf32>
    %39 = vector.shape_cast %38 : vector<1x32xf32> to vector<1x1x32xf32>
    %40 = arith.addf %36, %39 : vector<1x1x32xf32>
    %c0_31 = arith.constant 0 : index
    %c0_32 = arith.constant 0 : index
    %c0_33 = arith.constant 0 : index
    %41 = vector.load %arg11[%c0_31, %c0_32, %c0_33] : memref<1x1x32xf32, #tpu.memory_space<vmem>>, vector<1x1x32xf32>
    tpu.vector_store %arg11[%c0_31, %c0_32, %c0_33], %40 {strides = array<i32>} : memref<1x1x32xf32, #tpu.memory_space<vmem>>, vector<1x1x32xf32>,
    return
  }
  func.func @transform_0(%arg0: i32, %arg1: i32) -> (i32, i32, i32) {
    %c0_i32 = arith.constant 0 : i32
    %c0_i32_0 = arith.constant 0 : i32
    %c0_i32_1 = arith.constant 0 : i32
    return %arg0, %c0_i32, %c0_i32_0 : i32, i32, i32
  }
  func.func @transform_1(%arg0: i32, %arg1: i32) -> (i32, i32, i32) {
    %c0_i32 = arith.constant 0 : i32
    %c0_i32_0 = arith.constant 0 : i32
    %c0_i32_1 = arith.constant 0 : i32
    return %arg0, %c0_i32, %c0_i32_0 : i32, i32, i32
  }
  func.func @transform_2(%arg0: i32, %arg1: i32) -> (i32, i32, i32) {
    %c0_i32 = arith.constant 0 : i32
    %c0_i32_0 = arith.constant 0 : i32
    %c0_i32_1 = arith.constant 0 : i32
    return %arg0, %c0_i32, %c0_i32_0 : i32, i32, i32
  }
  func.func @transform_3(%arg0: i32, %arg1: i32) -> (i32, i32, i32) {
    %c0_i32 = arith.constant 0 : i32
    %c0_i32_0 = arith.constant 0 : i32
    return %arg0, %arg1, %c0_i32 : i32, i32, i32
  }
  func.func @transform_4(%arg0: i32, %arg1: i32) -> (i32, i32, i32) {
    %c0_i32 = arith.constant 0 : i32
    %c0_i32_0 = arith.constant 0 : i32
    return %arg0, %arg1, %c0_i32 : i32, i32, i32
  }
  func.func @transform_5(%arg0: i32, %arg1: i32) -> (i32, i32, i32) {
    %c0_i32 = arith.constant 0 : i32
    %c0_i32_0 = arith.constant 0 : i32
    return %arg0, %arg1, %c0_i32 : i32, i32, i32
  }
  func.func @transform_6(%arg0: i32, %arg1: i32) -> (i32, i32, i32) {
    %c0_i32 = arith.constant 0 : i32
    %c0_i32_0 = arith.constant 0 : i32
    return %arg0, %arg1, %c0_i32 : i32, i32, i32
  }
  func.func @transform_7(%arg0: i32, %arg1: i32) -> (i32, i32, i32) {
    %c0_i32 = arith.constant 0 : i32
    %c0_i32_0 = arith.constant 0 : i32
    return %arg0, %arg1, %c0_i32 : i32, i32, i32
  }
  func.func @transform_8(%arg0: i32, %arg1: i32) -> (i32, i32) {
    %c0_i32 = arith.constant 0 : i32
    %c0_i32_0 = arith.constant 0 : i32
    %c0_i32_1 = arith.constant 0 : i32
    return %c0_i32, %c0_i32_0 : i32, i32
  }
  func.func @transform_9(%arg0: i32, %arg1: i32) -> (i32, i32, i32) {
    %c0_i32 = arith.constant 0 : i32
    %c0_i32_0 = arith.constant 0 : i32
    %c0_i32_1 = arith.constant 0 : i32
    return %arg0, %c0_i32, %c0_i32_0 : i32, i32, i32
  }
}

</mosaic_0001>

<bundles_post_ra>
// kernel: tpu_custom_call.1
= control target key start
LH: loop header
LB: loop body
LE: loop exit
PB: predicated region body
PF: predicated region fallthrough
CT: control target
= control target key end

     0   :  { %v2279_v3 = vmov 0   ;;  %s2281_s15 = smov 64   ;;  %s3306_s0 = inlined_call_operand.vmem [shape: f32[2,1,1], index: 0, kind: input, shape index: {}]   ;;  %s3307_s1 = inlined_call_operand.vmem [shape: f32[2,1,1], index: 1, kind: input, shape index: {}]   ;;  %s3308_s2 = inlined_call_operand.vmem [shape: f32[2,1,1], index: 2, kind: input, shape index: {}]   ;;  %s3309_s3 = inlined_call_operand.vmem [shape: bf16[2,128,32], index: 3, kind: input, shape index: {}]   ;;  %s3310_s4 = inlined_call_operand.vmem [shape: bf16[2,128,32], index: 4, kind: input, shape index: {}]   ;;  %s3311_s5 = inlined_call_operand.vmem [shape: bf16[2,128,32], index: 5, kind: input, shape index: {}]   ;;  %s3312_s6 = inlined_call_operand.vmem [shape: bf16[2,128,32], index: 6, kind: input, shape index: {}]   ;;  %s3313_s7 = inlined_call_operand.vmem [shape: bf16[2,128,1], index: 7, kind: input, shape index: {}]   ;;  %s3314_s8 = inlined_call_operand.vmem [shape: bf16[96,32], index: 8, kind: input, shape index: {}]   ;;  %s3315_s9 = inlined_call_operand.hbm [shape: f32[1,1,32], index: 9, kind: output, shape index: {}]  }
   0x1   :  { %v1505_v0 = vld [vmem:[%s3307_s1] ss:$0 sm:$0xff]  ;;  %2010 = vset.pattern.permute.xlu1 %v2279_v3  ;;  %2009 = vset.pattern.permute.xlu0 %v2279_v3  ;;  %v1889_v9 = vld [vmem:[%s3311_s5 + $0x48] sm:$0xff]   ;;  %v1506_v10 = vld [vmem:[%s3307_s1 + $0x1] ss:$0 sm:$0xff] }
   0x2   :  { %v1503_v1 = vld [vmem:[%s3306_s0] ss:$0 sm:$0xff]  ;;  %233 = vperm.xlu1 %2010, %v1505_v0   ;;  %v1504_v11 = vld [vmem:[%s3306_s0 + $0x1] ss:$0 sm:$0xff]  ;;  %v1881_v12 = vld [vmem:[%s3311_s5 + $0x8] sm:$0xff]   ;;  %v1697_v14 = vunpack.c.l.bf16 %v1889_v9  ;;  %v1698_v16 = vunpack.c.h.bf16 %v1889_v9  ;;  %s2280_s0 = smov 32  }
   0x3   :  { %v1888_v2 = vld [vmem:[%s3311_s5 + $0x40] sm:$0xff]   ;;  %181 = vperm.xlu0 %2009, %v1503_v1   ;;  %v1665_v17 = vunpack.c.l.bf16 %v1881_v12  ;;  %v1666_v18 = vunpack.c.h.bf16 %v1881_v12  ;;  %v1904_v27 = vld [vmem:[%s3312_s6 + $0x48] sm:$0xff]   ;;  %v1890_v35 = vld [vmem:[%s3311_s5 + $0x50] sm:$0xff]  }
   0x4   :  { %v1693_v4 = vunpack.c.l.bf16 %v1888_v2  ;;  %v1694_v5 = vunpack.c.h.bf16 %v1888_v2  ;;  %v1660_v6 = vld [vmem:[%s3311_s5] sm:$0xff]   ;;  %v2026_v23 = vpack.i.bf16 %v1698_v16, %v1697_v14  ;;  %v1896_v28 = vld [vmem:[%s3312_s6 + $0x8] sm:$0xff]   ;;  %v1761_v30 = vunpack.c.l.bf16 %v1904_v27  ;;  %v1882_v36 = vld [vmem:[%s3311_s5 + $0x10] sm:$0xff]  }
   0x5   :  { %v1661_v7 = vunpack.c.l.bf16 %v1660_v6  ;;  %v1662_v8 = vunpack.c.h.bf16 %v1660_v6  ;;  %v1903_v19 = vld [vmem:[%s3312_s6 + $0x40] sm:$0xff]   ;;  %v2021_v24 = vpack.i.bf16 %v1666_v18, %v1665_v17  ;;  %v1762_v32 = vunpack.c.h.bf16 %v1904_v27  ;;  %v1891_v43 = vld [vmem:[%s3311_s5 + $0x58] sm:$0xff]   ;;  %v2251_v45 = vld [vmem:[%s3314_s8 + $0x28] sm:$0xff]  }
   0x6   :  { %v2016_v13 = vpack.i.bf16 %v1694_v5, %v1693_v4  ;;  %237 = vperm.xlu1 %2010, %v1506_v10   ;;  %v1724_v20 = vld [vmem:[%s3312_s6] sm:$0xff]   ;;  %v1757_v21 = vunpack.c.l.bf16 %v1903_v19  ;;  %v1758_v22 = vunpack.c.h.bf16 %v1903_v19  ;;  %v1729_v33 = vunpack.c.l.bf16 %v1896_v28  ;;  %v1883_v44 = vld [vmem:[%s3311_s5 + $0x18] sm:$0xff]   ;;  %1948 = vmatprep.subr.bf16.mxu0 %v2251_v45  ;;  %v1905_v53 = vld [vmem:[%s3312_s6 + $0x50] sm:$0xff]  }
   0x7   :  { %185 = vperm.xlu0 %2009, %v1504_v11   ;;  %v2011_v15 = vpack.i.bf16 %v1662_v8, %v1661_v7  ;;  %v1725_v25 = vunpack.c.l.bf16 %v1724_v20  ;;  %v1726_v26 = vunpack.c.h.bf16 %v1724_v20  ;;  %v1730_v34 = vunpack.c.h.bf16 %v1896_v28  ;;  %v2252_v46 = vld [vmem:[%s3314_s8 + $0x20] sm:$0xff]   ;;  %1992 = vmatprep.subr.bf16.mxu1 %v2251_v45  ;;  %v1897_v54 = vld [vmem:[%s3312_s6 + $0x10] sm:$0xff]   ;;  %v2253_v55 = vld [vmem:[%s3314_s8 + $0x18] sm:$0xff]  }
   0x8   :  { %v2036_v29 = vpack.i.bf16 %v1758_v22, %v1757_v21  ;;  %v1701_v37 = vunpack.c.l.bf16 %v1890_v35  ;;  %v1702_v38 = vunpack.c.h.bf16 %v1890_v35  ;;  %v2046_v39 = vpack.i.bf16 %v1762_v32, %v1761_v30  ;;  %1949 = vmatpush3.bf16.msra.mxu0 %v2251_v45  ;;  %1998 = vmatpush3.bf16.msra.mxu1 %v2251_v45  ;;  %v1906_v62 = vld [vmem:[%s3312_s6 + $0x58] sm:$0xff]   ;;  %v2254_v0 = vld [vmem:[%s3314_s8 + $0x10] sm:$0xff]   ;;  %v1892_v7 = vld [vmem:[%s3311_s5 + $0x60] sm:$0xff]  }
   0x9   :  { %v2031_v31 = vpack.i.bf16 %v1726_v26, %v1725_v25  ;;  %v2041_v40 = vpack.i.bf16 %v1730_v34, %v1729_v33  ;;  %v1669_v41 = vunpack.c.l.bf16 %v1882_v36  ;;  %v1670_v42 = vunpack.c.h.bf16 %v1882_v36  ;;  %1950 = vmatprep.subr.bf16.mxu0 %v2252_v46  ;;  %1993 = vmatprep.subr.bf16.mxu1 %v2252_v46  ;;  %v1898_v63 = vld [vmem:[%s3312_s6 + $0x18] sm:$0xff]   ;;  %v1884_v8 = vld [vmem:[%s3311_s5 + $0x20] sm:$0xff]   ;;  %v2255_v9 = vld [vmem:[%s3314_s8 + $0x8] sm:$0xff]  }
   0xa   :  { %2017 = vrot.lane.b32.xlu1 %v2016_v13, %s2280_s0  ;;  %v2056_v47 = vpack.i.bf16 %v1702_v38, %v1701_v37  ;;  %v1705_v48 = vunpack.c.l.bf16 %v1891_v43  ;;  %v1706_v50 = vunpack.c.h.bf16 %v1891_v43  ;;  %v1673_v51 = vunpack.c.l.bf16 %v1883_v44  ;;  %v1893_v16 = vld [vmem:[%s3311_s5 + $0x68] sm:$0xff]   ;;  %v2256_v18 = vld [vmem:[%s3314_s8] sm:$0xff]  }
   0xb   :  { %2012 = vrot.lane.b32.xlu0 %v2011_v15, %s2280_s0  ;;  %v2051_v49 = vpack.i.bf16 %v1670_v42, %v1669_v41  ;;  %v1674_v52 = vunpack.c.h.bf16 %v1883_v44  ;;  %v1765_v56 = vunpack.c.l.bf16 %v1905_v53  ;;  %v1766_v57 = vunpack.c.h.bf16 %v1905_v53  ;;  %v1885_v17 = vld [vmem:[%s3311_s5 + $0x28] sm:$0xff]  }
   0xc   :  { %v2066_v58 = vpack.i.bf16 %v1706_v50, %v1705_v48  ;;  %v1733_v60 = vunpack.c.l.bf16 %v1897_v54  ;;  %v1734_v61 = vunpack.c.h.bf16 %v1897_v54  ;;  %1951 = vmatpush3.bf16.msra.mxu0 %v2252_v46  ;;  %1999 = vmatpush3.bf16.msra.mxu1 %v2252_v46  ;;  %v1769_v2 = vunpack.c.l.bf16 %v1906_v62 }
   0xd   :  { %v2061_v59 = vpack.i.bf16 %v1674_v52, %v1673_v51  ;;  %1952 = vmatprep.subr.bf16.mxu0 %v2253_v55  ;;  %1994 = vmatprep.subr.bf16.mxu1 %v2253_v55  ;;  %v2076_v1 = vpack.i.bf16 %v1766_v57, %v1765_v56  ;;  %v1770_v4 = vunpack.c.h.bf16 %v1906_v62  ;;  %v1737_v5 = vunpack.c.l.bf16 %v1898_v63 }
   0xe   :  { %2027 = vrot.lane.b32.xlu1 %v2026_v23, %s2280_s0  ;;  %v2071_v3 = vpack.i.bf16 %v1734_v61, %v1733_v60  ;;  %v1738_v6 = vunpack.c.h.bf16 %v1898_v63  ;;  %v1709_v10 = vunpack.c.l.bf16 %v1892_v7  ;;  %v1710_v11 = vunpack.c.h.bf16 %v1892_v7 }
   0xf   :  { %2022 = vrot.lane.b32.xlu0 %v2021_v24, %s2280_s0  ;;  %v2086_v12 = vpack.i.bf16 %v1770_v4, %v1769_v2  ;;  %v1677_v14 = vunpack.c.l.bf16 %v1884_v8  ;;  %v1678_v15 = vunpack.c.h.bf16 %v1884_v8  ;;  %v1713_v20 = vunpack.c.l.bf16 %v1893_v16 }
  0x10   :  { %1953 = vmatpush3.bf16.msra.mxu0 %v2253_v55  ;;  %2000 = vmatpush3.bf16.msra.mxu1 %v2253_v55  ;;  %v2081_v13 = vpack.i.bf16 %v1738_v6, %v1737_v5  ;;  %v2096_v19 = vpack.i.bf16 %v1710_v11, %v1709_v10 }
  0x11   :  { %1954 = vmatprep.subr.bf16.mxu0 %v2254_v0  ;;  %1995 = vmatprep.subr.bf16.mxu1 %v2254_v0 }
  0x12   :  { %2037 = vrot.lane.b32.xlu1 %v2036_v29, %s2281_s15 }
  0x13   :  { %2032 = vrot.lane.b32.xlu0 %v2031_v31, %s2281_s15 }
  0x14   :  { %1955 = vmatpush3.bf16.msra.mxu0 %v2254_v0  ;;  %2001 = vmatpush3.bf16.msra.mxu1 %v2254_v0 }
  0x15   :  { %1956 = vmatprep.subr.bf16.mxu0 %v2255_v9  ;;  %1996 = vmatprep.subr.bf16.mxu1 %v2255_v9 }
  0x16   :  { %2047 = vrot.lane.b32.xlu1 %v2046_v39, %s2281_s15 }
  0x17   :  { %2042 = vrot.lane.b32.xlu0 %v2041_v40, %s2281_s15 }
  0x1a   :  { %2057 = vrot.lane.b32.xlu1 %v2056_v47, %s2280_s0 }
  0x1b   :  { %2052 = vrot.lane.b32.xlu0 %v2051_v49, %s2280_s0 }
  0x1e   :  { %2067 = vrot.lane.b32.xlu1 %v2066_v58, %s2280_s0 }
  0x1f   :  { %2062 = vrot.lane.b32.xlu0 %v2061_v59, %s2280_s0 }
  0x22   :  { %2077 = vrot.lane.b32.xlu1 %v2076_v1, %s2281_s15 }
  0x23   :  { %2072 = vrot.lane.b32.xlu0 %v2071_v3, %s2281_s15 }
  0x24   :  { %14 = vsyncpa [#allocation3], 0  ;;  %v2091_v21 = vpack.i.bf16 %v1678_v15, %v1677_v14  ;;  %v1714_v22 = vunpack.c.h.bf16 %v1893_v16  ;;  %v1681_v23 = vunpack.c.l.bf16 %v1885_v17  ;;  %v1682_v24 = vunpack.c.h.bf16 %v1885_v17  ;;  %v1907_v25 = vld [vmem:[%s3312_s6 + $0x60] sm:$0xff]   ;;  %1957 = vmatpush3.bf16.msra.mxu0 %v2255_v9  ;;  %2002 = vmatpush3.bf16.msra.mxu1 %v2255_v9  ;;  %v1908_v33 = vld [vmem:[%s3312_s6 + $0x68] sm:$0xff]  }
  0x25   :  { %v1899_v26 = vld [vmem:[%s3312_s6 + $0x20] sm:$0xff]   ;;  %1958 = vmatprep.subr.bf16.mxu0 %v2256_v18  ;;  %1997 = vmatprep.subr.bf16.mxu1 %v2256_v18  ;;  %v1773_v27 = vunpack.c.l.bf16 %v1907_v25  ;;  %v1774_v28 = vunpack.c.h.bf16 %v1907_v25  ;;  %v1900_v34 = vld [vmem:[%s3312_s6 + $0x28] sm:$0xff]   ;;  %v1777_v36 = vunpack.c.l.bf16 %v1908_v33  ;;  %v1778_v38 = vunpack.c.h.bf16 %v1908_v33  ;;  %v1894_v41 = vld [vmem:[%s3311_s5 + $0x70] sm:$0xff]  }
  0x26   :  { %2087 = vrot.lane.b32.xlu1 %v2086_v12, %s2281_s15  ;;  %v2106_v29 = vpack.i.bf16 %v1714_v22, %v1713_v20  ;;  %v2101_v30 = vpack.i.bf16 %v1682_v24, %v1681_v23  ;;  %v1741_v31 = vunpack.c.l.bf16 %v1899_v26  ;;  %v1742_v32 = vunpack.c.h.bf16 %v1899_v26  ;;  %v1886_v42 = vld [vmem:[%s3311_s5 + $0x30] sm:$0xff]   ;;  %v1895_v49 = vld [vmem:[%s3311_s5 + $0x78] sm:$0xff]   ;;  %v1911_v11 = vld [vmem:[%s3313_s7 + $0x8] sm:$0xff]  }
  0x27   :  { %2082 = vrot.lane.b32.xlu0 %v2081_v13, %s2281_s15  ;;  %v2116_v35 = vpack.i.bf16 %v1774_v28, %v1773_v27  ;;  %v1745_v39 = vunpack.c.l.bf16 %v1900_v34  ;;  %v1746_v40 = vunpack.c.h.bf16 %v1900_v34  ;;  %v1717_v43 = vunpack.c.l.bf16 %v1894_v41  ;;  %v1887_v50 = vld [vmem:[%s3311_s5 + $0x38] sm:$0xff]   ;;  %v1909_v57 = vld [vmem:[%s3312_s6 + $0x70] sm:$0xff]   ;;  %v1788_v12 = vld [vmem:[%s3313_s7] sm:$0xff]  }
  0x28   :  { %1959 = vmatpush3.bf16.msra.mxu0 %v2256_v18  ;;  %2003 = vmatpush3.bf16.msra.mxu1 %v2256_v18  ;;  %v2111_v37 = vpack.i.bf16 %v1742_v32, %v1741_v31  ;;  %v1718_v44 = vunpack.c.h.bf16 %v1894_v41  ;;  %v2126_v45 = vpack.i.bf16 %v1778_v38, %v1777_v36  ;;  %v1685_v47 = vunpack.c.l.bf16 %v1886_v42  ;;  %v1901_v58 = vld [vmem:[%s3312_s6 + $0x30] sm:$0xff]   ;;  %v1910_v1 = vld [vmem:[%s3312_s6 + $0x78] sm:$0xff]   ;;  %v1919_v17 = vld [vmem:[%s3313_s7 + $0x48] sm:$0xff]  }
  0x29   :  { %v2121_v46 = vpack.i.bf16 %v1746_v40, %v1745_v39  ;;  %v1686_v48 = vunpack.c.h.bf16 %v1886_v42  ;;  %v1721_v52 = vunpack.c.l.bf16 %v1895_v49  ;;  %v1722_v54 = vunpack.c.h.bf16 %v1895_v49  ;;  %v1902_v2 = vld [vmem:[%s3312_s6 + $0x38] sm:$0xff]   ;;  %v1530_v18 = vld [vmem:[%s3308_s2 + $0x1] ss:$0 sm:$0xff]  ;;  %v1912_v27 = vld [vmem:[%s3313_s7 + $0x10] sm:$0xff]  }
  0x2a   :  { %2097 = vrot.lane.b32.xlu1 %v2096_v19, %s2280_s0  ;;  %v2136_v51 = vpack.i.bf16 %v1718_v44, %v1717_v43  ;;  %v1689_v55 = vunpack.c.l.bf16 %v1887_v50  ;;  %v1690_v56 = vunpack.c.h.bf16 %v1887_v50  ;;  %v1781_v59 = vunpack.c.l.bf16 %v1909_v57  ;;  %v1529_v19 = vld [vmem:[%s3308_s2] ss:$0 sm:$0xff]  ;;  %v1920_v28 = vld [vmem:[%s3313_s7 + $0x50] sm:$0xff]   ;;  %v1921_v36 = vld [vmem:[%s3313_s7 + $0x58] sm:$0xff]  }
  0x2b   :  { %2092 = vrot.lane.b32.xlu0 %v2091_v21, %s2280_s0  ;;  %v2131_v53 = vpack.i.bf16 %v1686_v48, %v1685_v47  ;;  %v1782_v60 = vunpack.c.h.bf16 %v1909_v57  ;;  %v2146_v61 = vpack.i.bf16 %v1722_v54, %v1721_v52  ;;  %v1749_v63 = vunpack.c.l.bf16 %v1901_v58  ;;  %v1918_v20 = vld [vmem:[%s3313_s7 + $0x40] sm:$0xff]   ;;  %v1923_v52 = vld [vmem:[%s3313_s7 + $0x68] sm:$0xff]  }
  0x2c   :  { %v2141_v62 = vpack.i.bf16 %v1690_v56, %v1689_v55  ;;  %v1750_v0 = vunpack.c.h.bf16 %v1901_v58  ;;  %v1785_v4 = vunpack.c.l.bf16 %v1910_v1  ;;  %v1786_v6 = vunpack.c.h.bf16 %v1910_v1  ;;  %v1914_v43 = vld [vmem:[%s3313_s7 + $0x20] sm:$0xff]  }
  0x2d   :  { %v2156_v3 = vpack.i.bf16 %v1782_v60, %v1781_v59  ;;  %v1753_v7 = vunpack.c.l.bf16 %v1902_v2  ;;  %v1754_v8 = vunpack.c.h.bf16 %v1902_v2  ;;  %v1793_v13 = vunpack.c.l.bf16 %v1911_v11  ;;  %v1922_v44 = vld [vmem:[%s3313_s7 + $0x60] sm:$0xff]   ;;  %v1916_v59 = vld [vmem:[%s3313_s7 + $0x30] sm:$0xff]  }
  0x2e   :  { %2107 = vrot.lane.b32.xlu1 %v2106_v29, %s2280_s0  ;;  %v2151_v5 = vpack.i.bf16 %v1750_v0, %v1749_v63  ;;  %v2166_v9 = vpack.i.bf16 %v1786_v6, %v1785_v4  ;;  %v1794_v14 = vunpack.c.h.bf16 %v1911_v11  ;;  %v1789_v15 = vunpack.c.l.bf16 %v1788_v12  ;;  %v1924_v60 = vld [vmem:[%s3313_s7 + $0x70] sm:$0xff]   ;;  %v1925_v4 = vld [vmem:[%s3313_s7 + $0x78] sm:$0xff]  }
  0x2f   :  { %2102 = vrot.lane.b32.xlu0 %v2101_v30, %s2280_s0  ;;  %v2161_v10 = vpack.i.bf16 %v1754_v8, %v1753_v7  ;;  %v1790_v16 = vunpack.c.h.bf16 %v1788_v12  ;;  %v1825_v22 = vunpack.c.l.bf16 %v1919_v17  ;;  %v1826_v24 = vunpack.c.h.bf16 %v1919_v17  ;;  %v2569_v17 = vld [vmem:[%s3309_s3] sm:$0xff]  }
  0x30   :  { %v2176_v21 = vpack.i.bf16 %v1794_v14, %v1793_v13  ;;  %v1821_v25 = vunpack.c.l.bf16 %v1918_v20  ;;  %v1822_v26 = vunpack.c.h.bf16 %v1918_v20  ;;  %v1798_v29 = vunpack.c.h.bf16 %v1912_v27  ;;  %v2549_v13 = vld [vmem:[%s3309_s3 + $0x48] sm:$0xff]   ;;  %v2576_v20 = vld [vmem:[%s3310_s4] sm:$0xff]  }
  0x31   :  { %v2171_v23 = vpack.i.bf16 %v1790_v16, %v1789_v15  ;;  %v1830_v30 = vunpack.c.h.bf16 %v1920_v28  ;;  %v2186_v31 = vpack.i.bf16 %v1826_v24, %v1825_v22  ;;  %v1797_v33 = vunpack.c.l.bf16 %v1912_v27  ;;  %v2554_v14 = vld [vmem:[%s3310_s4 + $0x48] sm:$0xff]   ;;  %v2595_v27 = vld [vmem:[%s3309_s3 + $0x50] sm:$0xff]  }
  0x32   :  { %2117 = vrot.lane.b32.xlu1 %v2116_v35, %s2281_s15  ;;  %v2181_v32 = vpack.i.bf16 %v1822_v26, %v1821_v25  ;;  %v1829_v34 = vunpack.c.l.bf16 %v1920_v28  ;;  %v1913_v35 = vld [vmem:[%s3313_s7 + $0x18] sm:$0xff]   ;;  %v1834_v40 = vunpack.c.h.bf16 %v1921_v36  ;;  %v1833_v42 = vunpack.c.l.bf16 %v1921_v36  ;;  %v2559_v15 = vld [vmem:[%s3309_s3 + $0x8] sm:$0xff]   ;;  %v2590_v26 = vld [vmem:[%s3310_s4 + $0x40] sm:$0xff]  }
  0x33   :  { %2112 = vrot.lane.b32.xlu0 %v2111_v37, %s2281_s15  ;;  %v2196_v37 = vpack.i.bf16 %v1830_v30, %v1798_v29  ;;  %v1802_v38 = vunpack.c.h.bf16 %v1913_v35  ;;  %v1801_v41 = vunpack.c.l.bf16 %v1913_v35  ;;  %v1805_v49 = vunpack.c.l.bf16 %v1914_v43  ;;  %v2564_v16 = vld [vmem:[%s3310_s4 + $0x8] sm:$0xff]  }
  0x34   :  { %v2191_v39 = vpack.i.bf16 %v1829_v34, %v1797_v33  ;;  %v1837_v50 = vunpack.c.l.bf16 %v1922_v44  ;;  %v1842_v56 = vunpack.c.h.bf16 %v1923_v52  ;;  %v1841_v58 = vunpack.c.l.bf16 %v1923_v52  ;;  %v2609_v33 = vld [vmem:[%s3309_s3 + $0x10] sm:$0xff]  }
  0x35   :  { %v2206_v47 = vpack.i.bf16 %v1834_v40, %v1802_v38  ;;  %v2201_v48 = vpack.i.bf16 %v1833_v42, %v1801_v41  ;;  %v1813_v1 = vunpack.c.l.bf16 %v1916_v59  ;;  %v1845_v2 = vunpack.c.l.bf16 %v1924_v60  ;;  %v2618_v38 = vld [vmem:[%s3310_s4 + $0x10] sm:$0xff]  }
  0x36   :  { %2127 = vrot.lane.b32.xlu1 %v2126_v45, %s2281_s15  ;;  %v1806_v45 = vunpack.c.h.bf16 %v1914_v43  ;;  %v2211_v55 = vpack.i.bf16 %v1837_v50, %v1805_v49  ;;  %v1850_v8 = vunpack.c.h.bf16 %v1925_v4  ;;  %v3321_v22 = vunpack.c.l.bf16 %v2554_v14  ;;  %v2646_v50 = vld [vmem:[%s3310_s4 + $0x18] sm:$0xff]  }
  0x37   :  { %2122 = vrot.lane.b32.xlu0 %v2121_v46, %s2281_s15  ;;  %v1838_v46 = vunpack.c.h.bf16 %v1922_v44  ;;  %v2231_v7 = vpack.i.bf16 %v1845_v2, %v1813_v1  ;;  %v1537_v24 = vunpack.c.l.bf16 %v2559_v15  ;;  %v1538_v25 = vunpack.c.h.bf16 %v2559_v15  ;;  %v2632_v44 = vld [vmem:[%s3310_s4 + $0x58] sm:$0xff]   ;;  %v2683_v1 = vld [vmem:[%s3309_s3 + $0x68] sm:$0xff]   ;;  %v2724_v2 = vld [vmem:[%s3310_s4 + $0x70] sm:$0xff]  }
  0x38   :  { %v3316_v28 = vunpack.c.l.bf16 %v2564_v16  ;;  %v3317_v29 = vunpack.c.h.bf16 %v2564_v16  ;;  %v1533_v30 = vunpack.c.l.bf16 %v2569_v17  ;;  %v3318_v34 = vunpack.c.l.bf16 %v2576_v20 }
  0x39   :  { %v3319_v35 = vunpack.c.h.bf16 %v2576_v20  ;;  %v3320_v40 = vunpack.c.l.bf16 %v2590_v26  ;;  %v3322_v41 = vunpack.c.h.bf16 %v2590_v26  ;;  %v1573_v42 = vunpack.c.l.bf16 %v2595_v27 }
  0x3a   :  { %2137 = vrot.lane.b32.xlu1 %v2136_v51, %s2280_s0  ;;  %v1915_v51 = vld [vmem:[%s3313_s7 + $0x28] sm:$0xff]   ;;  %v1542_v49 = vunpack.c.h.bf16 %v2609_v33  ;;  %vm688_vm0 = vcmask 261120   ;;  %vm721_vm1 = vcmask 523264   ;;  %vm818_vm2 = vcmask 785408  }
  0x3b   :  { %2132 = vrot.lane.b32.xlu0 %v2131_v53, %s2280_s0  ;;  %v2216_v53 = vpack.i.bf16 %v1838_v46, %v1806_v45  ;;  %v1810_v54 = vunpack.c.h.bf16 %v1915_v51  ;;  %v1809_v57 = vunpack.c.l.bf16 %v1915_v51  ;;  %v2637_v45 = vld [vmem:[%s3309_s3 + $0x18] sm:$0xff]   ;;  %v2651_v51 = vld [vmem:[%s3309_s3 + $0x60] sm:$0xff]   ;;  %vm38_vm3 = vcmask 253952  }
  0x3d   :  { %v2226_v63 = vpack.i.bf16 %v1842_v56, %v1810_v54  ;;  %v2221_v0 = vpack.i.bf16 %v1841_v58, %v1809_v57  ;;  %v3323_v54 = vunpack.c.l.bf16 %v2618_v38  ;;  %v2664_v58 = vld [vmem:[%s3310_s4 + $0x60] sm:$0xff]  }
  0x3e   :  { %2147 = vrot.lane.b32.xlu1 %v2146_v61, %s2280_s0  ;;  %v1814_v61 = vunpack.c.h.bf16 %v1916_v59  ;;  %v2669_v59 = vld [vmem:[%s3309_s3 + $0x20] sm:$0xff]  }
  0x3f   :  { %2142 = vrot.lane.b32.xlu0 %v2141_v62, %s2280_s0  ;;  %v1846_v62 = vunpack.c.h.bf16 %v1924_v60 }
  0x42   :  { %2157 = vrot.lane.b32.xlu1 %v2156_v3, %s2281_s15  ;;  %v1917_v3 = vld [vmem:[%s3313_s7 + $0x38] sm:$0xff]  }
  0x43   :  { %2152 = vrot.lane.b32.xlu0 %v2151_v5, %s2281_s15  ;;  %v2236_v5 = vpack.i.bf16 %v1846_v62, %v1814_v61  ;;  %v1818_v6 = vunpack.c.h.bf16 %v1917_v3 }
  0x45   :  { %v2246_v11 = vpack.i.bf16 %v1850_v8, %v1818_v6  ;;  %v2692_v6 = vld [vmem:[%s3310_s4 + $0x68] sm:$0xff]   ;;  %v2738_v8 = vld [vmem:[%s3310_s4 + $0x30] sm:$0xff]  }
  0x46   :  { %2167 = vrot.lane.b32.xlu1 %v2166_v9, %s2281_s15  ;;  %v1817_v9 = vunpack.c.l.bf16 %v1917_v3 }
  0x47   :  { %2162 = vrot.lane.b32.xlu0 %v2161_v10, %s2281_s15  ;;  %v1849_v10 = vunpack.c.l.bf16 %v1925_v4 }
  0x49   :  { %v2241_v12 = vpack.i.bf16 %v1849_v10, %v1817_v9 }
  0x4a   :  { %1045 = vperm.xlu1 %2010, %v1530_v18   ;;  %v1569_v18 = vunpack.c.l.bf16 %v2549_v13 }
  0x4b   :  { %1041 = vperm.xlu0 %2009, %v1529_v19   ;;  %v1570_v19 = vunpack.c.h.bf16 %v2549_v13 }
  0x4e   :  { %2177 = vperm.xlu1 %2010, %v2176_v21   ;;  %v2581_v21 = vld [vmem:[%s3309_s3 + $0x40] sm:$0xff]  }
  0x4f   :  { %2172 = vperm.xlu0 %2009, %v2171_v23   ;;  %v3324_v23 = vunpack.c.h.bf16 %v2554_v14  ;;  %v1565_v36 = vunpack.c.l.bf16 %v2581_v21 }
  0x52   :  { %2187 = vperm.xlu1 %2010, %v2186_v31   ;;  %v1534_v31 = vunpack.c.h.bf16 %v2569_v17 }
  0x53   :  { %2182 = vperm.xlu0 %2009, %v2181_v32   ;;  %v2604_v32 = vld [vmem:[%s3310_s4 + $0x50] sm:$0xff]  }
  0x56   :  { %2197 = vperm.xlu1 %2010, %v2196_v37   ;;  %v1566_v37 = vunpack.c.h.bf16 %v2581_v21 }
  0x57   :  { %2192 = vperm.xlu0 %2009, %v2191_v39   ;;  %v2623_v39 = vld [vmem:[%s3309_s3 + $0x58] sm:$0xff]  }
  0x5a   :  { %2207 = vperm.xlu1 %2010, %v2206_v47  }
  0x5b   :  { %2202 = vperm.xlu0 %2009, %v2201_v48   ;;  %v1541_v48 = vunpack.c.l.bf16 %v2609_v33 }
  0x5e   :  { %2217 = vperm.xlu1 %2010, %v2216_v53  }
  0x5f   :  { %2212 = vperm.xlu0 %2009, %v2211_v55  }
  0x62   :  { %2227 = vperm.xlu1 %2010, %v2226_v63   ;;  %v2729_v63 = vld [vmem:[%s3309_s3 + $0x30] sm:$0xff]  }
  0x63   :  { %2222 = vperm.xlu0 %2009, %v2221_v0   ;;  %v2678_v0 = vld [vmem:[%s3310_s4 + $0x20] sm:$0xff]  }
  0x66   :  { %2237 = vperm.xlu1 %2010, %v2236_v5   ;;  %v2711_v5 = vld [vmem:[%s3309_s3 + $0x70] sm:$0xff]  }
  0x67   :  { %2232 = vperm.xlu0 %2009, %v2231_v7   ;;  %v2697_v7 = vld [vmem:[%s3309_s3 + $0x28] sm:$0xff]  }
  0x6a   :  { %2247 = vperm.xlu1 %2010, %v2246_v11  }
  0x6b   :  { %2242 = vperm.xlu0 %2009, %v2241_v12   ;;  %v2706_v12 = vld [vmem:[%s3310_s4 + $0x28] sm:$0xff]  }
  0x7d   :  { %v2653_v52 = vpop.permute.xlu1 %233 }
  0x7e   :  { %v2655_v53 = vpop.permute.xlu0 %181  ;;  %v242_v57 = vmul.f32 %v3316_v28, %v2653_v52  ;;  %v243_v11 = vmul.f32 %v3317_v29, %v2653_v52  ;;  %v240_v28 = vmul.f32 %v3318_v34, %v2653_v52  ;;  %v241_v15 = vmul.f32 %v3319_v35, %v2653_v52 }
  0x7f   :  { %v190_v61 = vmul.f32 %v1537_v24, %v2655_v53  ;;  %v191_v10 = vmul.f32 %v1538_v25, %v2655_v53  ;;  %v188_v24 = vmul.f32 %v1533_v30, %v2655_v53  ;;  %v189_v62 = vmul.f32 %v1534_v31, %v2655_v53 }
  0x80   :  { %v2800_v21 = vmul.f32 %v1542_v49, %v2655_v53 }
  0x81   :  { %v2713_v4 = vpop.permute.xlu1 %237  ;;  %v274_v60 = vadd.f32 %v242_v57, %v190_v61  ;;  %v272_v43 = vadd.f32 %v240_v28, %v188_v24 }
  0x82   :  { %v2715_v3 = vpop.permute.xlu0 %185  ;;  %v256_v30 = vmul.f32 %v3320_v40, %v2713_v4  ;;  %v258_v17 = vmul.f32 %v3321_v22, %v2713_v4  ;;  %v2795_v22 = vmul.f32 %v1541_v48, %v2655_v53  ;;  %v259_v48 = vmul.f32 %v3324_v23, %v2713_v4 }
  0x83   :  { %v204_v25 = vmul.f32 %v1565_v36, %v2715_v3  ;;  %v206_v29 = vmul.f32 %v1569_v18, %v2715_v3  ;;  %v205_v31 = vmul.f32 %v1566_v37, %v2715_v3  ;;  %v257_v36 = vmul.f32 %v3322_v41, %v2713_v4 }
  0x84   :  { %v275_v18 = vadd.f32 %v243_v11, %v191_v10  ;;  %v273_v41 = vadd.f32 %v241_v15, %v189_v62  ;;  %v207_v28 = vmul.f32 %v1570_v19, %v2715_v3 }
  0x85   :  { %v2018_v47 = vpop.permute.xlu1 %2017  ;;  %v288_v55 = vadd.f32 %v256_v30, %v204_v25  ;;  %v290_v57 = vadd.f32 %v258_v17, %v206_v29  ;;  %v289_v33 = vadd.f32 %v257_v36, %v205_v31 }
  0x86   :  { %v2013_v46 = vpop.permute.xlu0 %2012  ;;  %v2019_v34 = vunpack.i.l.bf16 %v2018_v47  ;;  %v2020_v37 = vunpack.i.h.bf16 %v2018_v47 }
  0x87   :  { %v2015_v35 = vunpack.i.h.bf16 %v2013_v46  ;;  %v2014_v40 = vunpack.i.l.bf16 %v2013_v46  ;;  %v2805_v46 = vmul.f32 %v3323_v54, %v2653_v52 }
  0x88   :  { %v705_v11 = vsel %vm688_vm0, %v288_v55, %v2019_v34  ;;  %v706_v23 = vsel %vm688_vm0, %v289_v33, %v2020_v37  ;;  %v2824_v34 = vld [vmem:[%s3309_s3 + $0x78] sm:$0xff]  }
  0x89   :  { %v2028_v56 = vpop.permute.xlu1 %2027  ;;  %v689_v62 = vsel %vm688_vm0, %v272_v43, %v2014_v40  ;;  %v690_v10 = vsel %vm688_vm0, %v273_v41, %v2015_v35  ;;  %v291_v35 = vadd.f32 %v259_v48, %v207_v28  ;;  %v1593_v28 = vunpack.c.l.bf16 %v2824_v34 }
  0x8a   :  { %v2023_v9 = vpop.permute.xlu0 %2022  ;;  %v2029_v49 = vunpack.i.l.bf16 %v2028_v56  ;;  %v2030_v19 = vunpack.i.h.bf16 %v2028_v56 }
  0x8b   :  { %v2025_v30 = vunpack.i.h.bf16 %v2023_v9  ;;  %v2024_v54 = vunpack.i.l.bf16 %v2023_v9 }
  0x8c   :  { %v707_v41 = vsel %vm688_vm0, %v290_v57, %v2029_v49 }
  0x8d   :  { %v2038_v61 = vpop.permute.xlu1 %2037 }
  0x8e   :  { %v2033_v47 = vpop.permute.xlu0 %2032  ;;  %v2040_v24 = vunpack.i.h.bf16 %v2038_v61  ;;  %v2039_v15 = vunpack.i.l.bf16 %v2038_v61 }
  0x8f   :  { %v2035_v25 = vunpack.i.h.bf16 %v2033_v47  ;;  %v2034_v13 = vunpack.i.l.bf16 %v2033_v47  ;;  %v708_v47 = vsel %vm688_vm0, %v291_v35, %v2030_v19  ;;  %v3330_v19 = vunpack.c.h.bf16 %v2595_v27 }
  0x90   :  { %v738_v31 = vsel %vm721_vm1, %v705_v11, %v2039_v15  ;;  %v739_v40 = vsel %vm721_vm1, %v706_v23, %v2040_v24  ;;  %v691_v23 = vsel %vm688_vm0, %v274_v60, %v2024_v54  ;;  %v2840_v54 = vld [vmem:[%s3309_s3 + $0x38] sm:$0xff]   ;;  %v208_v24 = vmul.f32 %v1573_v42, %v2715_v3 }
  0x91   :  { %v722_v29 = vsel %vm721_vm1, %v689_v62, %v2034_v13  ;;  %v723_v17 = vsel %vm721_vm1, %v690_v10, %v2035_v25  ;;  %v2048_v43 = vpop.permute.xlu1 %2047  ;;  %v762_v9 = vpack.c.bf16 %v739_v40, %v738_v31  ;;  %v692_v62 = vsel %vm688_vm0, %v275_v18, %v2025_v30 }
  0x92   :  { %v2043_v55 = vpop.permute.xlu0 %2042  ;;  %v754_v56 = vpack.c.bf16 %v723_v17, %v722_v29  ;;  %v2050_v36 = vunpack.i.h.bf16 %v2048_v43  ;;  %v2049_v37 = vunpack.i.l.bf16 %v2048_v43  ;;  %v3329_v25 = vunpack.c.h.bf16 %v2618_v38 }
  0x93   :  { %v2045_v33 = vunpack.i.h.bf16 %v2043_v55  ;;  %v2044_v61 = vunpack.i.l.bf16 %v2043_v55  ;;  %1976 = vmatprep.mubr.msk.bf16.mxu1 %vm818_vm2, %v762_v9  ;;  %v209_v30 = vmul.f32 %v3330_v19, %v2715_v3  ;;  %v3331_v29 = vunpack.c.l.bf16 %v2604_v32 }
  0x94   :  { %1960 = vmatprep.mubr.msk.bf16.mxu0 %vm818_vm2, %v754_v56  ;;  %v740_v48 = vsel %vm721_vm1, %v707_v41, %v2049_v37  ;;  %v741_v57 = vsel %vm721_vm1, %v708_v47, %v2050_v36  ;;  %v245_v13 = vmul.f32 %v3329_v25, %v2653_v52  ;;  %v3332_v31 = vunpack.c.h.bf16 %v2604_v32 }
  0x95   :  { %v724_v49 = vsel %vm721_vm1, %v691_v23, %v2044_v61  ;;  %v725_v10 = vsel %vm721_vm1, %v692_v62, %v2045_v33  ;;  %v763_v60 = vpack.c.bf16 %v741_v57, %v740_v48  ;;  %v2058_v11 = vpop.permute.xlu1 %2057  ;;  %v260_v17 = vmul.f32 %v3331_v29, %v2713_v4 }
  0x96   :  { %v755_v18 = vpack.c.bf16 %v725_v10, %v724_v49  ;;  %v2053_v15 = vpop.permute.xlu0 %2052  ;;  %v261_v40 = vmul.f32 %v3332_v31, %v2713_v4  ;;  %v3333_v42 = vunpack.c.l.bf16 %v2623_v39  ;;  %v3334_v27 = vunpack.c.h.bf16 %v2623_v39 }
  0x97   :  { %1977 = vmatmul.mubr.msk.bf16.vlgmr.msra.gmra.mxu1 %vm818_vm2, %v763_v60  ;;  %v3335_v43 = vunpack.c.l.bf16 %v2632_v44  ;;  %v3336_v56 = vunpack.c.h.bf16 %v2632_v44  ;;  %v1561_v36 = vunpack.c.l.bf16 %v2840_v54  ;;  %v3337_v37 = vunpack.c.l.bf16 %v2637_v45 }
  0x98   :  { %v210_v35 = vmul.f32 %v3333_v42, %v2715_v3  ;;  %1961 = vmatmul.mubr.msk.bf16.vlgmr.msra.gmra.mxu0 %vm818_vm2, %v755_v18  ;;  %v211_v41 = vmul.f32 %v3334_v27, %v2715_v3  ;;  %v3338_v61 = vunpack.c.h.bf16 %v2637_v45  ;;  %v3339_v39 = vunpack.c.l.bf16 %v2646_v50 }
  0x99   :  { %v262_v55 = vmul.f32 %v3335_v43, %v2713_v4  ;;  %v263_v9 = vmul.f32 %v3336_v56, %v2713_v4  ;;  %v194_v33 = vmul.f32 %v3337_v37, %v2655_v53  ;;  %v3340_v62 = vunpack.c.h.bf16 %v2646_v50  ;;  %v2068_v60 = vpop.permute.xlu1 %2067 }
  0x9a   :  { %v195_v47 = vmul.f32 %v3338_v61, %v2655_v53  ;;  %v246_v23 = vmul.f32 %v3339_v39, %v2653_v52  ;;  %v2060_v57 = vunpack.i.h.bf16 %v2058_v11  ;;  %v2059_v49 = vunpack.i.l.bf16 %v2058_v11  ;;  %v2063_v18 = vpop.permute.xlu0 %2062 }
  0x9b   :  { %v247_v48 = vmul.f32 %v3340_v62, %v2653_v52  ;;  %v2054_v10 = vunpack.i.l.bf16 %v2053_v15  ;;  %v1562_v25 = vunpack.c.h.bf16 %v2840_v54  ;;  %v292_v19 = vadd.f32 %v260_v17, %v208_v24 }
  0x9c   :  { %v293_v29 = vadd.f32 %v261_v40, %v209_v30  ;;  %v276_v45 = vadd.f32 %v2805_v46, %v2795_v22  ;;  %v277_v31 = vadd.f32 %v245_v13, %v2800_v21  ;;  %v2055_v42 = vunpack.i.h.bf16 %v2053_v15 }
  0x9d   :  { %v294_v27 = vadd.f32 %v262_v55, %v210_v35  ;;  %v295_v43 = vadd.f32 %v263_v9, %v211_v41  ;;  %v3341_v56 = vunpack.c.l.bf16 %v2651_v51  ;;  %v278_v11 = vadd.f32 %v246_v23, %v194_v33  ;;  %v2078_v13 = vpop.permute.xlu1 %2077 }
  0x9e   :  { %v279_v61 = vadd.f32 %v247_v48, %v195_v47  ;;  %v3342_v39 = vunpack.c.h.bf16 %v2651_v51  ;;  %v3343_v24 = vunpack.c.l.bf16 %v2664_v58  ;;  %v709_v22 = vsel %vm688_vm0, %v292_v19, %v2059_v49  ;;  %v2073_v17 = vpop.permute.xlu0 %2072 }
  0x9f   :  { %v212_v37 = vmul.f32 %v3341_v56, %v2715_v3  ;;  %v710_v21 = vsel %vm688_vm0, %v293_v29, %v2060_v57  ;;  %v693_v46 = vsel %vm688_vm0, %v276_v45, %v2054_v10  ;;  %v2069_v15 = vunpack.i.l.bf16 %v2068_v60  ;;  %v2908_v10 = vld [vmem:[%s3310_s4 + $0x38] sm:$0xff]  }
  0xa0   :  { %v213_v62 = vmul.f32 %v3342_v39, %v2715_v3  ;;  %v264_v30 = vmul.f32 %v3343_v24, %v2713_v4  ;;  %v2080_v40 = vunpack.i.h.bf16 %v2078_v13  ;;  %v2079_v35 = vunpack.i.l.bf16 %v2078_v13 }
  0xa1   :  { %v2075_v41 = vunpack.i.h.bf16 %v2073_v17  ;;  %v2074_v55 = vunpack.i.l.bf16 %v2073_v17  ;;  %v694_v51 = vsel %vm688_vm0, %v277_v31, %v2055_v42  ;;  %v2070_v9 = vunpack.i.h.bf16 %v2068_v60  ;;  %v2088_v60 = vpop.permute.xlu1 %2087 }
  0xa2   :  { %v2065_v33 = vunpack.i.h.bf16 %v2063_v18  ;;  %v2064_v47 = vunpack.i.l.bf16 %v2063_v18  ;;  %v742_v23 = vsel %vm721_vm1, %v709_v22, %v2079_v35  ;;  %v743_v48 = vsel %vm721_vm1, %v710_v21, %v2080_v40  ;;  %v2083_v31 = vpop.permute.xlu0 %2082 }
  0xa3   :  { %v726_v57 = vsel %vm721_vm1, %v693_v46, %v2074_v55  ;;  %v727_v49 = vsel %vm721_vm1, %v694_v51, %v2075_v41  ;;  %v711_v19 = vsel %vm688_vm0, %v294_v27, %v2069_v15  ;;  %v764_v29 = vpack.c.bf16 %v743_v48, %v742_v23 }
  0xa4   :  { %v756_v45 = vpack.c.bf16 %v727_v49, %v726_v57  ;;  %v3344_v18 = vunpack.c.h.bf16 %v2664_v58  ;;  %v2090_v56 = vunpack.i.h.bf16 %v2088_v60  ;;  %v2089_v39 = vunpack.i.l.bf16 %v2088_v60 }
  0xa5   :  { %v2085_v24 = vunpack.i.h.bf16 %v2083_v31  ;;  %v2084_v22 = vunpack.i.l.bf16 %v2083_v31  ;;  %v712_v21 = vsel %vm688_vm0, %v295_v43, %v2070_v9  ;;  %v695_v46 = vsel %vm688_vm0, %v278_v11, %v2064_v47  ;;  %1980 = vmatprep.mubr.msk.bf16.mxu1 %vm818_vm2, %v764_v29  ;;  %v2098_v55 = vpop.permute.xlu1 %2097 }
  0xa6   :  { %v265_v42 = vmul.f32 %v3344_v18, %v2713_v4  ;;  %v696_v13 = vsel %vm688_vm0, %v279_v61, %v2065_v33  ;;  %1964 = vmatprep.mubr.msk.bf16.mxu0 %vm818_vm2, %v756_v45  ;;  %v3328_v27 = vunpack.c.l.bf16 %v2908_v10  ;;  %v744_v15 = vsel %vm721_vm1, %v711_v19, %v2089_v39  ;;  %v2093_v11 = vpop.permute.xlu0 %2092 }
  0xa7   :  { %v745_v17 = vsel %vm721_vm1, %v712_v21, %v2090_v56  ;;  %v728_v40 = vsel %vm721_vm1, %v695_v46, %v2084_v22  ;;  %v729_v35 = vsel %vm721_vm1, %v696_v13, %v2085_v24  ;;  %v3345_v61 = vunpack.c.l.bf16 %v2669_v59 }
  0xa8   :  { %v765_v41 = vpack.c.bf16 %v745_v17, %v744_v15  ;;  %v757_v43 = vpack.c.bf16 %v729_v35, %v728_v40  ;;  %v3346_v9 = vunpack.c.h.bf16 %v2669_v59  ;;  %v3347_v47 = vunpack.c.l.bf16 %v2678_v0 }
  0xa9   :  { %v196_v51 = vmul.f32 %v3345_v61, %v2655_v53  ;;  %v3348_v48 = vunpack.c.h.bf16 %v2678_v0  ;;  %v3349_v49 = vunpack.c.l.bf16 %v2683_v1  ;;  %v3350_v29 = vunpack.c.l.bf16 %v2692_v6 }
  0xaa   :  { %v197_v33 = vmul.f32 %v3346_v9, %v2655_v53  ;;  %v248_v23 = vmul.f32 %v3347_v47, %v2653_v52  ;;  %v296_v60 = vadd.f32 %v264_v30, %v212_v37  ;;  %1965 = vmatmul.mubr.msk.bf16.gmra.mxu0 %vm818_vm2, %v757_v43  ;;  %1981 = vmatmul.mubr.msk.bf16.gmra.mxu1 %vm818_vm2, %v765_v41  ;;  %v3351_v59 = vunpack.c.h.bf16 %v2683_v1  ;;  %v2108_v1 = vpop.permute.xlu1 %2107  ;;  %v2103_v17 = vpop.permute.xlu0 %2102 }
  0xab   :  { %v249_v57 = vmul.f32 %v3348_v48, %v2653_v52  ;;  %v214_v19 = vmul.f32 %v3349_v49, %v2715_v3  ;;  %v266_v45 = vmul.f32 %v3350_v29, %v2713_v4  ;;  %v3352_v18 = vunpack.c.h.bf16 %v2692_v6 }
  0xac   :  { %v215_v31 = vmul.f32 %v3351_v59, %v2715_v3  ;;  %v3326_v39 = vunpack.c.h.bf16 %v2908_v10  ;;  %v2100_v24 = vunpack.i.h.bf16 %v2098_v55  ;;  %v2099_v22 = vunpack.i.l.bf16 %v2098_v55 }
  0xad   :  { %v267_v56 = vmul.f32 %v3352_v18, %v2713_v4  ;;  %v3353_v21 = vunpack.c.l.bf16 %v2697_v7  ;;  %v3354_v30 = vunpack.c.l.bf16 %v2706_v12  ;;  %v297_v13 = vadd.f32 %v265_v42, %v213_v62 }
  0xae   :  { %v2094_v15 = vunpack.i.l.bf16 %v2093_v11  ;;  %v202_v40 = vmul.f32 %v1561_v36, %v2655_v53  ;;  %v203_v35 = vmul.f32 %v1562_v25, %v2655_v53  ;;  %v280_v41 = vadd.f32 %v248_v23, %v196_v51  ;;  %v2118_v48 = vpop.permute.xlu1 %2117 }
  0xaf   :  { %v198_v37 = vmul.f32 %v3353_v21, %v2655_v53  ;;  %v250_v46 = vmul.f32 %v3354_v30, %v2653_v52  ;;  %v281_v43 = vadd.f32 %v249_v57, %v197_v33  ;;  %v298_v55 = vadd.f32 %v266_v45, %v214_v19  ;;  %v2113_v57 = vpop.permute.xlu0 %2112 }
  0xb0   :  { %v3355_v61 = vunpack.c.h.bf16 %v2697_v7  ;;  %v2095_v47 = vunpack.i.h.bf16 %v2093_v11  ;;  %v299_v62 = vadd.f32 %v267_v56, %v215_v31  ;;  %v254_v42 = vmul.f32 %v3328_v27, %v2653_v52 }
  0xb1   :  { %v255_v36 = vmul.f32 %v3326_v39, %v2653_v52  ;;  %v713_v54 = vsel %vm688_vm0, %v296_v60, %v2099_v22  ;;  %v714_v25 = vsel %vm688_vm0, %v297_v13, %v2100_v24  ;;  %v3356_v51 = vunpack.c.h.bf16 %v2706_v12 }
  0xb2   :  { %v199_v9 = vmul.f32 %v3355_v61, %v2655_v53  ;;  %v282_v7 = vadd.f32 %v250_v46, %v198_v37  ;;  %v697_v11 = vsel %vm688_vm0, %v280_v41, %v2094_v15  ;;  %v2109_v23 = vunpack.i.l.bf16 %v2108_v1  ;;  %v2990_v46 = vld [vmem:[%s3310_s4 + $0x78] sm:$0xff]   ;;  %s2283_s4 = smov [#allocation2]  }
  0xb3   :  { %v251_v33 = vmul.f32 %v3356_v51, %v2653_v52  ;;  %v2978_v49 = vadd.f32 %v254_v42, %v202_v40  ;;  %v2980_v19 = vadd.f32 %v255_v36, %v203_v35  ;;  %v2120_v29 = vunpack.i.h.bf16 %v2118_v48  ;;  %v2128_v35 = vpop.permute.xlu1 %2127  ;;  %s1495_s18 = sshll.u32 %s2283_s4, 4  ;;  %s1496_s18 = int_to_ptr.vmem [resolvable:$true] %s1495_s18 }
  0xb4   :  { %v2119_v45 = vunpack.i.l.bf16 %v2118_v48  ;;  %v2115_v59 = vunpack.i.h.bf16 %v2113_v57  ;;  %v2114_v60 = vunpack.i.l.bf16 %v2113_v57  ;;  %v698_v31 = vsel %vm688_vm0, %v281_v43, %v2095_v47  ;;  %s2257_s2 = scalar_lea.vmem %s1496_s18, 16  ;;  %s2261_s19 = scalar_lea.vmem %s1496_s18, 32 }
  0xb5   :  { %v2110_v18 = vunpack.i.h.bf16 %v2108_v1  ;;  %v2105_v56 = vunpack.i.h.bf16 %v2103_v17  ;;  %v2104_v24 = vunpack.i.l.bf16 %v2103_v17  ;;  %v747_v21 = vsel %vm721_vm1, %v714_v25, %v2120_v29  ;;  %v2123_v17 = vpop.permute.xlu0 %2122  ;;  %p2258_p0 = scmp.ne.s32.totalorder %s1496_s18, %s2257_s2  ;;  %p2262_p1 = scmp.lt.s32.totalorder %s1496_s18, %s1496_s18 }
  0xb6   :  { %v746_v22 = vsel %vm721_vm1, %v713_v54, %v2119_v45  ;;  %v730_v37 = vsel %vm721_vm1, %v697_v11, %v2114_v60  ;;  %v731_v30 = vsel %vm721_vm1, %v698_v31, %v2115_v59  ;;  %v715_v13 = vsel %vm688_vm0, %v298_v55, %v2109_v23  ;;  %p2263_p2 = scmp.lt.s32.totalorder %s2261_s19, %s2257_s2 }
  0xb7   :  { %v283_v15 = vadd.f32 %v251_v33, %v199_v9  ;;  %v766_v40 = vpack.c.bf16 %v747_v21, %v746_v22  ;;  %v758_v1 = vpack.c.bf16 %v731_v30, %v730_v37  ;;  %v2130_v41 = vunpack.i.h.bf16 %v2128_v35  ;;  %v2138_v23 = vpop.permute.xlu1 %2137 }
  0xb8   :  { %v2129_v43 = vunpack.i.l.bf16 %v2128_v35  ;;  %v2125_v61 = vunpack.i.h.bf16 %v2123_v17  ;;  %v2124_v47 = vunpack.i.l.bf16 %v2123_v17  ;;  %v716_v42 = vsel %vm688_vm0, %v299_v62, %v2110_v18  ;;  %p2264_p3 = por %p2263_p2, %p2262_p1 }
  0xb9   :  { %v699_v36 = vsel %vm688_vm0, %v282_v7, %v2104_v24  ;;  %v700_v54 = vsel %vm688_vm0, %v283_v15, %v2105_v56  ;;  %1968 = vmatprep.mubr.msk.bf16.mxu0 %vm818_vm2, %v758_v1  ;;  %1984 = vmatprep.mubr.msk.bf16.mxu1 %vm818_vm2, %v766_v40  ;;  %v3327_v55 = vunpack.c.l.bf16 %v2990_v46  ;;  %v749_v25 = vsel %vm721_vm1, %v716_v42, %v2130_v41  ;;  %v2133_v7 = vpop.permute.xlu0 %2132 }
  0xba   :  { %v748_v9 = vsel %vm721_vm1, %v715_v13, %v2129_v43  ;;  %v732_v51 = vsel %vm721_vm1, %v699_v36, %v2124_v47  ;;  %v733_v33 = vsel %vm721_vm1, %v700_v54, %v2125_v61  ;;  %v3357_v48 = vunpack.c.l.bf16 %v2711_v5  ;;  %p2265_p4 = pnand %p2264_p3, %p2258_p0 }
  0xbb   :  { %v767_v11 = vpack.c.bf16 %v749_v25, %v748_v9  ;;  %v759_v62 = vpack.c.bf16 %v733_v33, %v732_v51  ;;  %v3358_v29 = vunpack.c.h.bf16 %v2711_v5  ;;  %v3359_v59 = vunpack.c.l.bf16 %v2724_v2  ;;  %v2148_v61 = vpop.permute.xlu1 %2147 }
  0xbc   :  { %v216_v57 = vmul.f32 %v3357_v48, %v2715_v3  ;;  %v1594_v31 = vunpack.c.h.bf16 %v2824_v34  ;;  %v3360_v18 = vunpack.c.h.bf16 %v2724_v2  ;;  %v3361_v24 = vunpack.c.l.bf16 %v2729_v63 }
  0xbd   :  { %v217_v45 = vmul.f32 %v3358_v29, %v2715_v3  ;;  %v268_v60 = vmul.f32 %v3359_v59, %v2713_v4  ;;  %v3362_v21 = vunpack.c.l.bf16 %v2738_v8  ;;  %1969 = vmatmul.mubr.msk.bf16.gmra.mxu0 %vm818_vm2, %v759_v62  ;;  %1985 = vmatmul.mubr.msk.bf16.gmra.mxu1 %vm818_vm2, %v767_v11  ;;  %v3325_v5 = vunpack.c.h.bf16 %v2990_v46  ;;  %v2143_v47 = vpop.permute.xlu0 %2142 }
  0xbe   :  { %v269_v56 = vmul.f32 %v3360_v18, %v2713_v4  ;;  %v200_v22 = vmul.f32 %v3361_v24, %v2655_v53  ;;  %v3363_v30 = vunpack.c.h.bf16 %v2729_v63  ;;  %v3364_v15 = vunpack.c.h.bf16 %v2738_v8 }
  0xbf   :  { %v252_v37 = vmul.f32 %v3362_v21, %v2653_v52  ;;  %v218_v1 = vmul.f32 %v1593_v28, %v2715_v3  ;;  %v270_v35 = vmul.f32 %v3327_v55, %v2713_v4  ;;  %v2140_v17 = vunpack.i.h.bf16 %v2138_v23  ;;  %v2158_v11 = vpop.permute.xlu1 %2157 }
  0xc0   :  { %v201_v13 = vmul.f32 %v3363_v30, %v2655_v53  ;;  %v253_v40 = vmul.f32 %v3364_v15, %v2653_v52  ;;  %v2139_v41 = vunpack.i.l.bf16 %v2138_v23  ;;  %v2134_v43 = vunpack.i.l.bf16 %v2133_v7 }
  0xc1   :  { %v300_v42 = vadd.f32 %v268_v60, %v216_v57  ;;  %v301_v63 = vadd.f32 %v269_v56, %v217_v45  ;;  %v2135_v53 = vunpack.i.h.bf16 %v2133_v7  ;;  %v284_v36 = vadd.f32 %v252_v37, %v200_v22  ;;  %v2153_v62 = vpop.permute.xlu0 %2152 }
  0xc2   :  { %v285_v54 = vadd.f32 %v253_v40, %v201_v13  ;;  %v219_v52 = vmul.f32 %v1594_v31, %v2715_v3  ;;  %v271_v34 = vmul.f32 %v3325_v5, %v2713_v4  ;;  %v302_v28 = vadd.f32 %v270_v35, %v218_v1 }
  0xc3   :  { %v717_v9 = vsel %vm688_vm0, %v300_v42, %v2139_v41  ;;  %v718_v25 = vsel %vm688_vm0, %v301_v63, %v2140_v17  ;;  %v701_v51 = vsel %vm688_vm0, %v284_v36, %v2134_v43  ;;  %v2149_v33 = vunpack.i.l.bf16 %v2148_v61  ;;  %v2168_v37 = vpop.permute.xlu1 %2167 }
  0xc4   :  { %v2160_v23 = vunpack.i.h.bf16 %v2158_v11  ;;  %v2159_v7 = vunpack.i.l.bf16 %v2158_v11  ;;  %v2155_v48 = vunpack.i.h.bf16 %v2153_v62  ;;  %v2154_v57 = vunpack.i.l.bf16 %v2153_v62 }
  0xc5   :  { %v702_v3 = vsel %vm688_vm0, %v285_v54, %v2135_v53  ;;  %v2150_v29 = vunpack.i.h.bf16 %v2148_v61  ;;  %v2145_v45 = vunpack.i.h.bf16 %v2143_v47  ;;  %v2144_v59 = vunpack.i.l.bf16 %v2143_v47  ;;  %v2163_v30 = vpop.permute.xlu0 %2162 }
  0xc6   :  { %v750_v4 = vsel %vm721_vm1, %v717_v9, %v2159_v7  ;;  %v751_v60 = vsel %vm721_vm1, %v718_v25, %v2160_v23  ;;  %v734_v31 = vsel %vm721_vm1, %v701_v51, %v2154_v57  ;;  %v735_v18 = vsel %vm721_vm1, %v702_v3, %v2155_v48 }
  0xc7   :  { %v303_v56 = vadd.f32 %v271_v34, %v219_v52  ;;  %v719_v24 = vsel %vm688_vm0, %v302_v28, %v2149_v33  ;;  %v768_v22 = vpack.c.bf16 %v751_v60, %v750_v4  ;;  %v760_v21 = vpack.c.bf16 %v735_v18, %v734_v31 }
  0xc8   :  { %v2170_v13 = vunpack.i.h.bf16 %v2168_v37  ;;  %v2169_v15 = vunpack.i.l.bf16 %v2168_v37  ;;  %v2165_v40 = vunpack.i.h.bf16 %v2163_v30  ;;  %v2164_v1 = vunpack.i.l.bf16 %v2163_v30 }
  0xc9   :  { %v720_v35 = vsel %vm688_vm0, %v303_v56, %v2150_v29  ;;  %v703_v17 = vsel %vm688_vm0, %v2978_v49, %v2144_v59  ;;  %v704_v41 = vsel %vm688_vm0, %v2980_v19, %v2145_v45  ;;  %1972 = vmatprep.mubr.msk.bf16.mxu0 %vm818_vm2, %v760_v21  ;;  %1988 = vmatprep.mubr.msk.bf16.mxu1 %vm818_vm2, %v768_v22  ;;  %v2282_v49 = vmov 0.0   ;;  %v3064_v19 = vpop.permute.xlu1 %1045  ;;  %v3066_v36 = vpop.permute.xlu0 %1041 }
  0xca   :  { %v752_v43 = vsel %vm721_vm1, %v719_v24, %v2169_v15  ;;  %v753_v61 = vsel %vm721_vm1, %v720_v35, %v2170_v13  ;;  %v736_v47 = vsel %vm721_vm1, %v703_v17, %v2164_v1  ;;  %v737_v42 = vsel %vm721_vm1, %v704_v41, %v2165_v40  ;;  %39 = vst.msk [vmem:[#allocation2] sm:$0x1] %vm38_vm3, %v2282_v49 }
  0xcb   :  { %v769_v63 = vpack.c.bf16 %v753_v61, %v752_v43  ;;  %v761_v53 = vpack.c.bf16 %v737_v42, %v736_v47  ;;  %v3365_v4 = vunpack.c.h.bf16 %v2576_v20  ;;  %v3366_v18 = vunpack.c.h.bf16 %v2590_v26 }
  0xcc   :  { %v3367_v15 = vunpack.c.l.bf16 %v2576_v20  ;;  %v3368_v1 = vunpack.c.l.bf16 %v2590_v26  ;;  %v3369_v49 = vunpack.c.l.bf16 %v2564_v16  ;;  %v3372_v39 = vunpack.c.h.bf16 %v2554_v14 }
  0xcd   :  { %1973 = vmatmul.mubr.msk.bf16.gmra.mxu0 %vm818_vm2, %v761_v53  ;;  %1989 = vmatmul.mubr.msk.bf16.gmra.mxu1 %vm818_vm2, %v769_v63  ;;  %v3068_v54 = vpop.permute.xlu1 %2177  ;;  %v3070_v52 = vpop.permute.xlu0 %2172 }
  0xce   :  { %v2180_v24 = vunpack.i.h.bf16 %v3068_v54  ;;  %v2179_v37 = vunpack.i.l.bf16 %v3068_v54  ;;  %v2175_v30 = vunpack.i.h.bf16 %v3070_v52  ;;  %v2174_v17 = vunpack.i.l.bf16 %v3070_v52 }
  0xd1   :  { %v3072_v34 = vpop.permute.xlu1 %2187  ;;  %v3074_v25 = vpop.permute.xlu0 %2182 }
  0xd2   :  { %v2190_v41 = vunpack.i.h.bf16 %v3072_v34  ;;  %v2189_v47 = vunpack.i.l.bf16 %v3072_v34  ;;  %v2185_v42 = vunpack.i.h.bf16 %v3074_v25  ;;  %v2184_v63 = vunpack.i.l.bf16 %v3074_v25 }
  0xd5   :  { %v3076_v23 = vpop.permute.xlu1 %2197  ;;  %v3078_v57 = vpop.permute.xlu0 %2192 }
  0xd6   :  { %v2200_v53 = vunpack.i.h.bf16 %v3076_v23  ;;  %v2199_v20 = vunpack.i.l.bf16 %v3076_v23 }
  0xd9   :  { %v3086_v31 = vpop.permute.xlu1 %2207  ;;  %v3095_v13 = vpop.permute.xlu0 %2202 }
 0x157   :  { %v1978_v9 = vpop.f32.mrf.mxu1 }
 0x158   :  { %v1962_v28 = vpop.f32.mrf.mxu0  ;;  %v1066_v21 = vadd.f32 %v1978_v9, %v3064_v19 }
 0x159   :  { %v965_v33 = vpop.f32.mrf.mxu1  ;;  %v1050_v22 = vadd.f32 %v1962_v28, %v3066_v36  ;;  %v3370_v28 = vunpack.c.l.bf16 %v2554_v14 }
 0x15a   :  { %v901_v51 = vpop.f32.mrf.mxu0  ;;  %v1064_v59 = vadd.f32 %v3064_v19, %v965_v33 }
 0x15b   :  { %v1979_v62 = vpop.f32.mrf.mxu1  ;;  %v1048_v45 = vadd.f32 %v3066_v36, %v901_v51  ;;  %v1082_v26 = vsub.f32 %v3369_v49, %v1050_v22  ;;  %v1098_v52 = vsub.f32 %v3370_v28, %v1066_v21  ;;  %v2205_v22 = vunpack.i.h.bf16 %v3095_v13  ;;  %v3121_v21 = vpop.permute.xlu0 %2212 }
 0x15c   :  { %v1963_v11 = vpop.f32.mrf.mxu0  ;;  %v1096_v35 = vsub.f32 %v3368_v1, %v1064_v59  ;;  %v2210_v59 = vunpack.i.h.bf16 %v3086_v31  ;;  %v3371_v49 = vunpack.c.h.bf16 %v2564_v16  ;;  %v2214_v16 = vunpack.i.l.bf16 %v3121_v21 }
 0x15d   :  { %v968_v48 = vpop.f32.mrf.mxu1  ;;  %v1080_v40 = vsub.f32 %v3367_v15, %v1048_v45  ;;  %v1051_v9 = vadd.f32 %v1963_v11, %v3066_v36  ;;  %v2194_v45 = vunpack.i.l.bf16 %v3078_v57  ;;  %v2209_v11 = vunpack.i.l.bf16 %v3086_v31 }
 0x15e   :  { %v904_v7 = vpop.f32.mrf.mxu0  ;;  %v1065_v29 = vadd.f32 %v3064_v19, %v968_v48  ;;  %v3114_v48 = vpop.permute.xlu1 %2217  ;;  %v1128_v25 = vand.u32 2147483647, %v1096_v35  ;;  %v1114_v1 = vand.u32 2147483647, %v1082_v26  ;;  %v1130_v35 = vand.u32 2147483647, %v1098_v52 }
 0x15f   :  { %v1049_v3 = vadd.f32 %v3066_v36, %v904_v7  ;;  %v2195_v7 = vunpack.i.h.bf16 %v3078_v57 }
 0x160   :  { %v1097_v56 = vsub.f32 %v3366_v18, %v1065_v29  ;;  %v1067_v29 = vadd.f32 %v1979_v62, %v3064_v19  ;;  %v2204_v62 = vunpack.i.l.bf16 %v3095_v13  ;;  %v1384_v5 = vmul.f32 %v2184_v63, %v1128_v25 }
 0x161   :  { %v1081_v60 = vsub.f32 %v3365_v4, %v1049_v3  ;;  %v1112_v3 = vand.u32 2147483647, %v1080_v40  ;;  %v3374_v63 = vunpack.c.l.bf16 %v2604_v32 }
 0x162   :  { %v1129_v61 = vand.u32 2147483647, %v1097_v56  ;;  %v1099_v55 = vsub.f32 %v3372_v39, %v1067_v29  ;;  %v1370_v39 = vmul.f32 %v2179_v37, %v1114_v1  ;;  %v3377_v37 = vunpack.c.h.bf16 %v2618_v38  ;;  %v3151_v1 = vpop.permute.xlu1 %2227 }
 0x163   :  { %v1113_v43 = vand.u32 2147483647, %v1081_v60  ;;  %v1368_v28 = vmul.f32 %v2174_v17, %v1112_v3  ;;  %v1386_v3 = vmul.f32 %v2189_v47, %v1130_v35 }
 0x164   :  { %v1385_v60 = vmul.f32 %v2185_v42, %v1129_v61 }
 0x165   :  { %v1369_v4 = vmul.f32 %v2175_v30, %v1113_v43  ;;  %v1083_v30 = vsub.f32 %v3371_v49, %v1051_v9  ;;  %v3373_v49 = vunpack.c.l.bf16 %v2618_v38  ;;  %v3375_v9 = vunpack.c.l.bf16 %v2646_v50 }
 0x167   :  { %v1115_v25 = vand.u32 2147483647, %v1083_v30 }
 0x16a   :  { %v1966_v51 = vpop.f32.mrf.mxu0  ;;  %v1982_v33 = vpop.f32.mrf.mxu1 }
 0x16b   :  { %v1054_v27 = vadd.f32 %v1966_v51, %v3066_v36  ;;  %v1070_v26 = vadd.f32 %v1982_v33, %v3064_v19  ;;  %v1400_v51 = vsel %vm688_vm0, %v1368_v28, 0.0  ;;  %v1401_v33 = vsel %vm688_vm0, %v1384_v5, 0.0 }
 0x16c   :  { %v917_v18 = vpop.f32.mrf.mxu0  ;;  %v981_v56 = vpop.f32.mrf.mxu1  ;;  %v1406_v5 = vsel %vm688_vm0, %v1370_v39, 0.0 }
 0x16d   :  { %v1052_v15 = vadd.f32 %v3066_v36, %v917_v18  ;;  %v1068_v40 = vadd.f32 %v3064_v19, %v981_v56  ;;  %v1403_v18 = vsel %vm688_vm0, %v1369_v4, 0.0  ;;  %v1404_v56 = vsel %vm688_vm0, %v1385_v60, 0.0 }
 0x16e   :  { %v1967_v43 = vpop.f32.mrf.mxu0  ;;  %v1983_v61 = vpop.f32.mrf.mxu1  ;;  %v1131_v60 = vand.u32 2147483647, %v1099_v55  ;;  %v1405_v42 = vadd.f32 %v1404_v56, %v1403_v18  ;;  %v1407_v18 = vsel %vm688_vm0, %v1386_v3, 0.0  ;;  %v1402_v56 = vadd.f32 %v1401_v33, %v1400_v51 }
 0x16f   :  { %v1084_v17 = vsub.f32 %v3373_v49, %v1052_v15  ;;  %v1100_v14 = vsub.f32 %v3374_v63, %v1068_v40  ;;  %v1086_v15 = vsub.f32 %v3375_v9, %v1054_v27  ;;  %v3376_v49 = vunpack.c.l.bf16 %v2632_v44  ;;  %v3166_v63 = vpop.permute.xlu0 %2222 }
 0x170   :  { %v920_v52 = vpop.f32.mrf.mxu0  ;;  %v984_v4 = vpop.f32.mrf.mxu1  ;;  %v1055_v28 = vadd.f32 %v1967_v43, %v3066_v36  ;;  %v1071_v27 = vadd.f32 %v1983_v61, %v3064_v19  ;;  %v1387_v38 = vmul.f32 %v2190_v41, %v1131_v60  ;;  %v3378_v9 = vunpack.c.h.bf16 %v2604_v32 }
 0x171   :  { %v1053_v29 = vadd.f32 %v3066_v36, %v920_v52  ;;  %v1102_v40 = vsub.f32 %v3376_v49, %v1070_v26  ;;  %v1116_v35 = vand.u32 2147483647, %v1084_v17  ;;  %v1132_v30 = vand.u32 2147483647, %v1100_v14 }
 0x172   :  { %v1069_v55 = vadd.f32 %v3064_v19, %v984_v4  ;;  %v1371_v26 = vmul.f32 %v2180_v24, %v1115_v25  ;;  %v1450_v52 = vsel %vm688_vm0, %v1405_v42, 0.0  ;;  %v2230_v17 = vunpack.i.h.bf16 %v3151_v1 }
 0x173   :  { %v1085_v47 = vsub.f32 %v3377_v37, %v1053_v29  ;;  %v1118_v14 = vand.u32 2147483647, %v1086_v15  ;;  %v1134_v39 = vand.u32 2147483647, %v1102_v40  ;;  %v1372_v29 = vmul.f32 %v2194_v45, %v1116_v35 }
 0x174   :  { %v1101_v43 = vsub.f32 %v3378_v9, %v1069_v55  ;;  %v1388_v54 = vmul.f32 %v2195_v7, %v1132_v30  ;;  %v3379_v24 = vunpack.c.h.bf16 %v2646_v50  ;;  %v2229_v61 = vunpack.i.l.bf16 %v3151_v1 }
 0x175   :  { %v1117_v3 = vand.u32 2147483647, %v1085_v47  ;;  %v1408_v42 = vadd.f32 %v1407_v18, %v1406_v5  ;;  %v1449_v32 = vsel %vm688_vm0, %v1402_v56, 0.0  ;;  %v3380_v25 = vunpack.c.h.bf16 %v2632_v44 }
 0x176   :  { %v1087_v34 = vsub.f32 %v3379_v24, %v1055_v28  ;;  %v1133_v41 = vand.u32 2147483647, %v1101_v43  ;;  %v2225_v60 = vunpack.i.h.bf16 %v3166_v63  ;;  %v1409_v45 = vsel %vm688_vm0, %v1371_v26, 0.0 }
 0x177   :  { %v1103_v4 = vsub.f32 %v3380_v25, %v1071_v27  ;;  %v1410_v57 = vsel %vm688_vm0, %v1387_v38, 0.0  ;;  %v1451_v7 = vadd.f32 %v1450_v52, %v1449_v32  ;;  %v1374_v50 = vmul.f32 %v2204_v62, %v1118_v14 }
 0x178   :  { %v1390_v15 = vmul.f32 %v2205_v22, %v1134_v39  ;;  %v1373_v49 = vmul.f32 %v2199_v20, %v1117_v3  ;;  %v1389_v44 = vmul.f32 %v2200_v53, %v1133_v41  ;;  %v1412_v47 = vsel %vm688_vm0, %v1372_v29, 0.0 }
 0x179   :  { %v1413_v35 = vsel %vm688_vm0, %v1388_v54, 0.0  ;;  %v1119_v30 = vand.u32 2147483647, %v1087_v34  ;;  %v1452_v62 = vsel %vm688_vm0, %v1408_v42, 0.0  ;;  %v1135_v55 = vand.u32 2147483647, %v1103_v4 }
 0x17a   :  { %v1411_v23 = vadd.f32 %v1410_v57, %v1409_v45  ;;  %v1453_v53 = vadd.f32 %v1452_v62, %v1451_v7  ;;  %v3381_v56 = vunpack.c.l.bf16 %v2678_v0  ;;  %v1414_v26 = vadd.f32 %v1413_v35, %v1412_v47 }
 0x17b   :  { %v1415_v38 = vsel %vm688_vm0, %v1373_v49, 0.0  ;;  %v1416_v52 = vsel %vm688_vm0, %v1389_v44, 0.0  ;;  %v3382_v9 = vunpack.c.l.bf16 %v2664_v58  ;;  %v1418_v39 = vsel %vm688_vm0, %v1374_v50, 0.0  ;;  %v3215_v50 = vpop.permute.xlu1 %2237 }
 0x17c   :  { %v1419_v3 = vsel %vm688_vm0, %v1390_v15, 0.0  ;;  %v1375_v29 = vmul.f32 %v2209_v11, %v1119_v30  ;;  %v1391_v24 = vmul.f32 %v2210_v59, %v1135_v55  ;;  %v3383_v34 = vunpack.c.l.bf16 %v2706_v12  ;;  %v3217_v15 = vpop.permute.xlu0 %2232 }
 0x17d   :  { %v1970_v51 = vpop.f32.mrf.mxu0  ;;  %v1986_v33 = vpop.f32.mrf.mxu1  ;;  %v2224_v4 = vunpack.i.l.bf16 %v3166_v63  ;;  %v3384_v45 = vunpack.c.l.bf16 %v2692_v6  ;;  %v1420_v11 = vadd.f32 %v1419_v3, %v1418_v39  ;;  %v1456_v31 = vsel %vm688_vm0, %v1414_v26, 0.0 }
 0x17e   :  { %v1058_v13 = vadd.f32 %v1970_v51, %v3066_v36  ;;  %v1074_v18 = vadd.f32 %v1986_v33, %v3064_v19  ;;  %v1454_v51 = vsel %vm688_vm0, %v1411_v23, 0.0  ;;  %v1417_v33 = vadd.f32 %v1416_v52, %v1415_v38 }
 0x17f   :  { %v933_v40 = vpop.f32.mrf.mxu0  ;;  %v997_v37 = vpop.f32.mrf.mxu1  ;;  %v1455_v7 = vadd.f32 %v1454_v51, %v1453_v53  ;;  %v3385_v44 = vunpack.i.h.bf16 %v3121_v21  ;;  %v1421_v30 = vsel %vm688_vm0, %v1375_v29, 0.0  ;;  %v2239_v23 = vunpack.i.l.bf16 %v3215_v50 }
 0x180   :  { %v1056_v28 = vadd.f32 %v3066_v36, %v933_v40  ;;  %v1072_v22 = vadd.f32 %v3064_v19, %v997_v37  ;;  %v1090_v41 = vsub.f32 %v3383_v34, %v1058_v13  ;;  %v1106_v57 = vsub.f32 %v3384_v45, %v1074_v18 }
 0x181   :  { %v1971_v20 = vpop.f32.mrf.mxu0  ;;  %v1987_v5 = vpop.f32.mrf.mxu1  ;;  %v3386_v37 = vunpack.c.h.bf16 %v2678_v0  ;;  %v1458_v13 = vsel %vm688_vm0, %v1417_v33, 0.0  ;;  %v2235_v0 = vunpack.i.h.bf16 %v3217_v15  ;;  %v1457_v53 = vadd.f32 %v1456_v31, %v1455_v7 }
 0x182   :  { %v1088_v27 = vsub.f32 %v3381_v56, %v1056_v28  ;;  %v1104_v43 = vsub.f32 %v3382_v9, %v1072_v22  ;;  %v1059_v59 = vadd.f32 %v1971_v20, %v3066_v36  ;;  %v1422_v28 = vsel %vm688_vm0, %v1391_v24, 0.0 }
 0x183   :  { %v936_v14 = vpop.f32.mrf.mxu0  ;;  %v1000_v25 = vpop.f32.mrf.mxu1  ;;  %v1122_v62 = vand.u32 2147483647, %v1090_v41  ;;  %v1075_v55 = vadd.f32 %v1987_v5, %v3064_v19  ;;  %v1138_v22 = vand.u32 2147483647, %v1106_v57  ;;  %v3388_v18 = vunpack.c.h.bf16 %v2706_v12 }
 0x184   :  { %v1120_v54 = vand.u32 2147483647, %v1088_v27  ;;  %v1136_v42 = vand.u32 2147483647, %v1104_v43  ;;  %v1057_v32 = vadd.f32 %v3066_v36, %v936_v14  ;;  %v1073_v35 = vadd.f32 %v3064_v19, %v1000_v25 }
 0x185   :  { %v1091_v56 = vsub.f32 %v3388_v18, %v1059_v59  ;;  %v3389_v5 = vunpack.i.l.bf16 %v3114_v48  ;;  %v1423_v9 = vadd.f32 %v1422_v28, %v1421_v30  ;;  %v1459_v43 = vadd.f32 %v1458_v13, %v1457_v53  ;;  %v2243_v13 = vpop.permute.xlu0 %2242 }
 0x186   :  { %v1376_v49 = vmul.f32 %v2214_v16, %v1120_v54  ;;  %v1392_v40 = vmul.f32 %v3385_v44, %v1136_v42  ;;  %v1089_v47 = vsub.f32 %v3386_v37, %v1057_v32  ;;  %v3387_v16 = vunpack.c.h.bf16 %v2664_v58 }
 0x187   :  { %v1378_v58 = vmul.f32 %v2224_v4, %v1122_v62  ;;  %v3390_v14 = vunpack.c.h.bf16 %v2692_v6  ;;  %v2234_v54 = vunpack.i.l.bf16 %v3217_v15  ;;  %v1460_v12 = vsel %vm688_vm0, %v1420_v11, 0.0 }
 0x188   :  { %v1121_v20 = vand.u32 2147483647, %v1089_v47  ;;  %v1105_v21 = vsub.f32 %v3387_v16, %v1073_v35  ;;  %v1424_v27 = vsel %vm688_vm0, %v1376_v49, 0.0  ;;  %v1425_v26 = vsel %vm688_vm0, %v1392_v40, 0.0 }
 0x189   :  { %v1107_v39 = vsub.f32 %v3390_v14, %v1075_v55  ;;  %v1394_v24 = vmul.f32 %v2225_v60, %v1138_v22  ;;  %v3391_v34 = vunpack.i.h.bf16 %v3114_v48  ;;  %v1426_v42 = vadd.f32 %v1425_v26, %v1424_v27 }
 0x18a   :  { %v1377_v38 = vmul.f32 %v3389_v5, %v1121_v20  ;;  %v1137_v52 = vand.u32 2147483647, %v1105_v21  ;;  %v1123_v32 = vand.u32 2147483647, %v1091_v56  ;;  %v1462_v60 = vsel %vm688_vm0, %v1423_v9, 0.0 }
 0x18b   :  { %v1461_v48 = vadd.f32 %v1460_v12, %v1459_v43  ;;  %v1430_v11 = vsel %vm688_vm0, %v1378_v58, 0.0  ;;  %v1139_v7 = vand.u32 2147483647, %v1107_v39  ;;  %v3392_v49 = vunpack.c.l.bf16 %v2738_v8 }
 0x18c   :  { %v1393_v41 = vmul.f32 %v3391_v34, %v1137_v52  ;;  %v1427_v25 = vsel %vm688_vm0, %v1377_v38, 0.0  ;;  %v3393_v40 = vunpack.c.l.bf16 %v2724_v2  ;;  %v1431_v35 = vsel %vm688_vm0, %v1394_v24, 0.0 }
 0x18d   :  { %v1974_v3 = vpop.f32.mrf.mxu0  ;;  %v1990_v29 = vpop.f32.mrf.mxu1  ;;  %v1464_v30 = vsel %vm688_vm0, %v1426_v42, 0.0  ;;  %v1379_v28 = vmul.f32 %v2229_v61, %v1123_v32  ;;  %v3394_v22 = vunpack.c.l.bf16 %v2908_v10  ;;  %v3395_v16 = vunpack.c.l.bf16 %v2990_v46 }
 0x18e   :  { %v1062_v4 = vadd.f32 %v1974_v3, %v3066_v36  ;;  %v1428_v33 = vsel %vm688_vm0, %v1393_v41, 0.0  ;;  %v1078_v45 = vadd.f32 %v1990_v29, %v3064_v19  ;;  %v1463_v56 = vadd.f32 %v1462_v60, %v1461_v48 }
 0x18f   :  { %v949_v6 = vpop.f32.mrf.mxu0  ;;  %v1013_v51 = vpop.f32.mrf.mxu1  ;;  %v1429_v15 = vadd.f32 %v1428_v33, %v1427_v25  ;;  %v1395_v27 = vmul.f32 %v2230_v17, %v1139_v7  ;;  %v3396_v26 = vunpack.c.h.bf16 %v2908_v10  ;;  %v3397_v43 = vunpack.c.h.bf16 %v2990_v46 }
 0x190   :  { %v1060_v57 = vadd.f32 %v3066_v36, %v949_v6  ;;  %v1076_v63 = vadd.f32 %v3064_v19, %v1013_v51  ;;  %v1094_v20 = vsub.f32 %v3394_v22, %v1062_v4  ;;  %v1110_v21 = vsub.f32 %v3395_v16, %v1078_v45  ;;  %v2248_v17 = vpop.permute.xlu1 %2247 }
 0x191   :  { %v1975_v31 = vpop.f32.mrf.mxu0  ;;  %v1991_v59 = vpop.f32.mrf.mxu1  ;;  %v1466_v38 = vsel %vm688_vm0, %v1429_v15, 0.0  ;;  %v2245_v14 = vunpack.i.h.bf16 %v2243_v13  ;;  %v2244_v39 = vunpack.i.l.bf16 %v2243_v13  ;;  %v1465_v3 = vadd.f32 %v1464_v30, %v1463_v56 }
 0x192   :  { %v1092_v44 = vsub.f32 %v3392_v49, %v1060_v57  ;;  %v1108_v37 = vsub.f32 %v3393_v40, %v1076_v63  ;;  %v1063_v47 = vadd.f32 %v1975_v31, %v3066_v36  ;;  %v1079_v62 = vadd.f32 %v1991_v59, %v3064_v19 }
 0x193   :  { %v952_v55 = vpop.f32.mrf.mxu0  ;;  %v3398_v29 = vunpack.c.h.bf16 %v2738_v8  ;;  %v1016_v1 = vpop.f32.mrf.mxu1  ;;  %v1432_v24 = vadd.f32 %v1431_v35, %v1430_v11  ;;  %v1433_v10 = vsel %vm688_vm0, %v1379_v28, 0.0  ;;  %v1126_v34 = vand.u32 2147483647, %v1094_v20 }
 0x194   :  { %v1124_v53 = vand.u32 2147483647, %v1092_v44  ;;  %v1140_v18 = vand.u32 2147483647, %v1108_v37  ;;  %v1095_v5 = vsub.f32 %v3396_v26, %v1063_v47  ;;  %v1061_v61 = vadd.f32 %v3066_v36, %v952_v55 }
 0x195   :  { %v1111_v58 = vsub.f32 %v3397_v43, %v1079_v62  ;;  %v1142_v36 = vand.u32 2147483647, %v1110_v21  ;;  %v1434_v41 = vsel %vm688_vm0, %v1395_v27, 0.0  ;;  %v1077_v8 = vadd.f32 %v3064_v19, %v1016_v1 }
 0x196   :  { %v1380_v52 = vmul.f32 %v2234_v54, %v1124_v53  ;;  %v1396_v9 = vmul.f32 %v2235_v0, %v1140_v18  ;;  %v1093_v12 = vsub.f32 %v3398_v29, %v1061_v61  ;;  %v1467_v54 = vadd.f32 %v1466_v38, %v1465_v3  ;;  %v1448_v38 = vld [vmem:[#allocation2] sm:$0x1] }
 0x197   :  { %v1127_v0 = vand.u32 2147483647, %v1095_v5  ;;  %v1143_v25 = vand.u32 2147483647, %v1111_v58  ;;  %v2250_v4 = vunpack.i.h.bf16 %v2248_v17  ;;  %v2249_v6 = vunpack.i.l.bf16 %v2248_v17 }
 0x198   :  { %v1125_v42 = vand.u32 2147483647, %v1093_v12  ;;  %v1436_v46 = vsel %vm688_vm0, %v1380_v52, 0.0  ;;  %v1437_v32 = vsel %vm688_vm0, %v1396_v9, 0.0  ;;  %v1382_v51 = vmul.f32 %v2244_v39, %v1126_v34 }
 0x199   :  { %v1398_v33 = vmul.f32 %v2245_v14, %v1142_v36  ;;  %v3399_v57 = vunpack.c.h.bf16 %v2724_v2  ;;  %v2240_v60 = vunpack.i.h.bf16 %v3215_v50  ;;  %v1468_v48 = vsel %vm688_vm0, %v1432_v24, 0.0 }
 0x19a   :  { %v1381_v45 = vmul.f32 %v2239_v23, %v1125_v42  ;;  %v1435_v11 = vadd.f32 %v1434_v41, %v1433_v10  ;;  %v1438_v7 = vadd.f32 %v1437_v32, %v1436_v46  ;;  %v1469_v31 = vadd.f32 %v1468_v48, %v1467_v54 }
 0x19b   :  { %v1109_v63 = vsub.f32 %v3399_v57, %v1077_v8  ;;  %v1383_v59 = vmul.f32 %v2249_v6, %v1127_v0  ;;  %v1399_v15 = vmul.f32 %v2250_v4, %v1143_v25  ;;  %v1442_v49 = vsel %vm688_vm0, %v1382_v51, 0.0 }
 0x19c   :  { %v1443_v44 = vsel %vm688_vm0, %v1398_v33, 0.0  ;;  %v1439_v40 = vsel %vm688_vm0, %v1381_v45, 0.0  ;;  %v1470_v2 = vsel %vm688_vm0, %v1435_v11, 0.0  ;;  %v1472_v37 = vsel %vm688_vm0, %v1438_v7, 0.0 }
 0x19d   :  { %v1141_v19 = vand.u32 2147483647, %v1109_v63  ;;  %v1471_v50 = vadd.f32 %v1470_v2, %v1469_v31  ;;  %v1445_v47 = vsel %vm688_vm0, %v1383_v59, 0.0  ;;  %v1446_v35 = vsel %vm688_vm0, %v1399_v15, 0.0 }
 0x19e   :  { %v1444_v28 = vadd.f32 %v1443_v44, %v1442_v49  ;;  %v1447_v13 = vadd.f32 %v1446_v35, %v1445_v47 }
 0x19f   :  { %v1397_v23 = vmul.f32 %v2240_v60, %v1141_v19  ;;  %v1473_v55 = vadd.f32 %v1472_v37, %v1471_v50 }
 0x1a0   :  { %v1476_v16 = vsel %vm688_vm0, %v1444_v28, 0.0  ;;  %v1478_v53 = vsel %vm688_vm0, %v1447_v13, 0.0 }
 0x1a1   :  { %v1440_v30 = vsel %vm688_vm0, %v1397_v23, 0.0 }
 0x1a2   :  { %v1441_v62 = vadd.f32 %v1440_v30, %v1439_v40 }
 0x1a4   :  { %v1474_v22 = vsel %vm688_vm0, %v1441_v62, 0.0 }
 0x1a5   :  { %v1475_v20 = vadd.f32 %v1474_v22, %v1473_v55 }
 0x1a7   :  { %v1477_v21 = vadd.f32 %v1476_v16, %v1475_v20 }
 0x1a9   :  { %v1479_v18 = vadd.f32 %v1478_v53, %v1477_v21 }
 0x1ab   :  { %v1480_v56 = vrot.slane %v1479_v18, 4 }
 0x1ad   :  { %v1481_v27 = vadd.f32 %v1480_v56, %v1479_v18 }
 0x1af   :  { %v1482_v26 = vrot.slane %v1481_v27, 2 }
 0x1b1   :  { %v1483_v5 = vadd.f32 %v1482_v26, %v1481_v27 }
 0x1b3   :  { %v1484_v61 = vrot.slane %v1483_v5, 1 }
 0x1b5   :  { %v1485_v52 = vadd.f32 %v1484_v61, %v1483_v5 }
 0x1b7   :  { %v1486_v9 = vadd.f32 %v1485_v52, %v1448_v38 }
 0x1b9   :  { %1488 = vst.msk [vmem:[#allocation2] sm:$0x1] %vm38_vm3, %v1486_v9 }
 0x1ba   :  { %2268 = shalt.err (!%p2265_p4)
}
 0x1bb   :  { %1498 = dma.vmem_to_hbm [thread:$0]  %s1496_s18, 16, %s3315_s9, [#allocation3]  }
 0x1bc   :  { %2277 = dma.done.wait [#allocation3], 16  }
 0x1bd   :  { %2278 = vsyncadd [#allocation3], 4294967280 }
 0x1be   :  { %1502 = vsyncpa [#allocation3], 1 }

</bundles_post_ra>
